<compile_context>
chip_gen: v5e
topology: v5e:2x2
jax: 0.10.0
libtpu: 0.0.40
codegen_flags: <defaults>
</compile_context>

<pallas_src>
from functools import partial

import jax
import jax.numpy as jnp
from jax import lax
from jax.experimental import pallas as pl
from jax.experimental.pallas import tpu as pltpu


def _diff_attn_kernel(x_ref, wq1_ref, wq2_ref, wk1_ref, wk2_ref, wv_ref,
                      bq1_ref, bq2_ref, bk1_ref, bk2_ref, bv_ref, lam_ref,
                      o_ref, *, batch_tile, seq_len, d_model, out_width,
                      compute_dtype):
    bt, s, d = batch_tile, seq_len, d_model
    cdt = compute_dtype

    x = x_ref[...].astype(cdt)                                         # (bt*s, d)

    def proj(w_ref, b_ref):
        # MXU matmul, f32 accumulation, then immediate downcast to the MXU
        # operand dtype (no large f32 projection slab stays live).
        y = jnp.dot(x, w_ref[...], preferred_element_type=jnp.float32) + b_ref[...]
        return y.astype(cdt)

    # The 1/sqrt(d_head) scale is already folded into wq1/wq2/bq1/bq2 (wrapper).
    q1 = proj(wq1_ref, bq1_ref).reshape(bt, s, d)
    q2 = proj(wq2_ref, bq2_ref).reshape(bt, s, d)
    k1 = proj(wk1_ref, bk1_ref).reshape(bt, s, d)
    k2 = proj(wk2_ref, bk2_ref).reshape(bt, s, d)
    v = proj(wv_ref, bv_ref).reshape(bt, s, out_width)                 # lane-dense width

    # q @ k^T: contract the feature dim directly (no materialized transpose).
    dn_qk = (((2,), (2,)), ((0,), (0,)))
    s1 = lax.dot_general(q1, k1, dn_qk, preferred_element_type=jnp.float32)
    s2 = lax.dot_general(q2, k2, dn_qk, preferred_element_type=jnp.float32)

    def _softmax(sc):
        # f32 VPU/EUP math on every generation; EUP approximate reciprocal.
        m = jnp.max(sc, axis=-1, keepdims=True)
        e = jnp.exp(sc - m)
        return e * pl.reciprocal(jnp.sum(e, axis=-1, keepdims=True), approx=True)

    a1 = _softmax(s1)
    a2 = _softmax(s2)

    # lambda_value broadcast over the key axis of the attention map (d_head == S),
    # exactly matching the PyTorch broadcast.  lam is precomputed in the wrapper.
    lam = lam_ref[...][None]                                           # (1, 1, s)
    scores = (a1 - lam * a2).astype(cdt)                               # MXU operand only

    dn_av = (((2,), (1,)), ((0,), (0,)))
    out = lax.dot_general(scores, v, dn_av, preferred_element_type=jnp.float32)
    o_ref[...] = out.reshape(bt * s, out_width).astype(o_ref.dtype)


def multi_head_differential_attention(x, params, *, num_heads, lambda_init=0.8,
                                      mxu_dtype=jnp.bfloat16, batch_tile=None,
                                      single_buffer_weights=True,
                                      deep_x_buffering=True):
    B, S, d_model = x.shape
    d = d_model
    two_d = 2 * d_model
    d_head = d_model // (2 * num_heads)
    # PyTorch's broadcast of a (d_head,) vector against (B, S, S) requires d_head == S.
    assert d_head == S, "reference semantics require d_head == seq_len"

    f32 = jnp.float32
    itemsize = jnp.dtype(mxu_dtype).itemsize

    # Lane-dense output: pad the V / output columns up to a multiple of 128.
    two_d_pad = ((two_d + 127) // 128) * 128
    pad_cols = two_d_pad - two_d

    # ---- grid-invariant parameter prep (hoisted out of the kernel) ----
    # Fold the softmax scale into the q weights/biases in f32 BEFORE any downcast.
    scale = 1.0 / float(d_head) ** 0.5
    wq1 = (params["wq"][:, :d] * scale).astype(mxu_dtype)
    wq2 = (params["wq"][:, d:] * scale).astype(mxu_dtype)
    wk1 = params["wk"][:, :d].astype(mxu_dtype)
    wk2 = params["wk"][:, d:].astype(mxu_dtype)
    wv = params["wv"]
    bv = params["bv"]
    if pad_cols:
        wv = jnp.pad(wv, ((0, 0), (0, pad_cols)))
        bv = jnp.pad(bv, ((0, 0), (0, pad_cols)))
    wv = wv.astype(mxu_dtype)
    bq1 = (params["bq"][:, :d] * scale).astype(f32)
    bq2 = (params["bq"][:, d:] * scale).astype(f32)
    bk1 = params["bk"][:, :d].astype(f32)
    bk2 = params["bk"][:, d:].astype(f32)
    bv = bv.astype(f32)
    lam = (jnp.exp(params["lambda_q1"] * params["lambda_k1"])
           - jnp.exp(params["lambda_q2"] * params["lambda_k2"])
           + lambda_init).astype(f32)                                  # (1, d_head)==(1, S)

    # ---- generation-aware VMEM budget (v7x: 64 MiB/TC, v5e/v6e: 128 MiB) ----
    try:
        vmem_cap = int(pltpu.get_tpu_info().vmem_capacity_bytes)
    except Exception:  # noqa: BLE001 - conservative default = v7x per-TC capacity
        vmem_cap = 64 * 1024 * 1024
    vmem_limit = int(vmem_cap * 0.75)            # leave compiler-scratch headroom

    w_resident = (itemsize * d * (4 * d + two_d_pad)          # weights
                  + 4 * (4 * d + two_d_pad) + 4 * S)          # biases + lambda (f32)
    if not single_buffer_weights:
        w_resident *= 2

    def _per_step_bytes(bt):
        rows = bt * S
        b = 2 * rows * d * 4                 # pipelined x slab (f32 in HBM)
        b += 2 * rows * two_d_pad * 4        # pipelined out slab (f32)
        b += 4 * rows * d * itemsize         # q1,q2,k1,k2 (compute dtype)
        b += rows * two_d_pad * itemsize     # v
        b += 3 * bt * S * S * 4              # f32 score / softmax maps live at once
        b += bt * S * S * itemsize           # downcast scores (MXU operand)
        b += rows * two_d_pad * 4            # f32 accumulator before the store
        return b + w_resident

    # ---- batch tiling: biggest legal divisor of B that fits the VMEM budget ----
    divisors = [t for t in range(B, 0, -1) if B % t == 0]
    legal = [t for t in divisors if (t * S) % 8 == 0 or t == B]
    if batch_tile is None:
        target_rows = 1024                   # good MXU M on all generations
        budget = int(vmem_limit * 0.6)       # margin for spills / compiler scratch
        batch_tile = legal[-1]               # smallest legal tile as last resort
        for t in legal:                      # largest first
            if t * S <= max(target_rows, S) and _per_step_bytes(t) <= budget:
                batch_tile = t
                break
    else:
        if batch_tile not in legal:
            batch_tile = next((t for t in legal if t <= batch_tile), legal[-1])
    grid = (B // batch_tile,)

    # x / out presented as 2-D slabs: B,S folded into the sublane axis of each block.
    x2d = x.reshape(B * S, d_model)

    def _const_spec(shape):
        # Grid-invariant operands: single-buffer them (no point double-buffering).
        if single_buffer_weights:
            return pl.BlockSpec(shape, lambda b: (0,) * len(shape),
                                pipeline_mode=pl.Buffered(1))
        return pl.BlockSpec(shape, lambda b: (0,) * len(shape))

    # Small-d (memory-bound) regime: deeper x pipelining when there are enough steps.
    if deep_x_buffering and d_model <= 256 and grid[0] >= 3:
        x_spec = pl.BlockSpec((batch_tile * S, d_model), lambda b: (b, 0),
                              pipeline_mode=pl.Buffered(3))
    else:
        x_spec = pl.BlockSpec((batch_tile * S, d_model), lambda b: (b, 0))

    # ---- advisory cost estimate for the XLA scheduler ----
    rows_total = B * S
    flops = (2 * rows_total * d * (4 * d + two_d_pad)    # projections
             + 4 * B * S * S * d                         # two QK matmuls
             + 2 * B * S * S * two_d_pad)                # AV matmul
    bytes_accessed = (rows_total * d * 4 + rows_total * two_d_pad * 4
                      + itemsize * d * (4 * d + two_d_pad)
                      + 4 * (4 * d + two_d_pad) + 4 * S)
    cost = pl.CostEstimate(flops=int(flops), transcendentals=int(2 * B * S * S),
                           bytes_accessed=int(bytes_accessed))

    kernel = partial(_diff_attn_kernel, batch_tile=batch_tile, seq_len=S,
                     d_model=d_model, out_width=two_d_pad, compute_dtype=mxu_dtype)

    out2d = pl.pallas_call(
        kernel,
        out_shape=jax.ShapeDtypeStruct((B * S, two_d_pad), jnp.float32),
        grid_spec=pltpu.PrefetchScalarGridSpec(
            num_scalar_prefetch=0,
            grid=grid,
            in_specs=[
                x_spec,
                _const_spec((d, d)), _const_spec((d, d)),        # wq1, wq2
                _const_spec((d, d)), _const_spec((d, d)),        # wk1, wk2
                _const_spec((d, two_d_pad)),                     # wv (lane-dense)
                _const_spec((1, d)), _const_spec((1, d)),        # bq1, bq2
                _const_spec((1, d)), _const_spec((1, d)),        # bk1, bk2
                _const_spec((1, two_d_pad)),                     # bv
                _const_spec((1, S)),                             # lambda row
            ],
            out_specs=pl.BlockSpec((batch_tile * S, two_d_pad), lambda b: (b, 0)),
        ),
        compiler_params=pltpu.CompilerParams(
            dimension_semantics=("parallel",),
            vmem_limit_bytes=vmem_limit,
        ),
        cost_estimate=cost,
    )(x2d, wq1, wq2, wk1, wk2, wv, bq1, bq2, bk1, bk2, bv, lam)

    if pad_cols:
        out2d = out2d[:, :two_d]
    return out2d.reshape(B, S, two_d)


def _reference(x, params, *, num_heads, lambda_init=0.8):
    """Pure-JAX mirror of the PyTorch forward for correctness checking."""
    d_model = x.shape[-1]
    d_head = d_model // (2 * num_heads)
    q = x @ params["wq"] + params["bq"][0]
    k = x @ params["wk"] + params["bk"][0]
    v = x @ params["wv"] + params["bv"][0]
    q1, q2 = q[..., :d_model], q[..., d_model:]
    k1, k2 = k[..., :d_model], k[..., d_model:]
    lam = (jnp.exp(params["lambda_q1"][0] * params["lambda_k1"][0])
           - jnp.exp(params["lambda_q2"][0] * params["lambda_k2"][0]) + lambda_init)
    scale = 1.0 / (d_head ** 0.5)
    a1 = jax.nn.softmax(jnp.einsum("bsd,btd->bst", q1, k1) * scale, axis=-1)
    a2 = jax.nn.softmax(jnp.einsum("bsd,btd->bst", q2, k2) * scale, axis=-1)
    scores = a1 - lam * a2
    return jnp.einsum("bst,btd->bsd", scores, v)


def _run_and_check(x, params, *, num_heads, mxu_dtype, atol, rtol, ref):
    """Try the most optimized spec config first; fall back if this JAX build
    rejects a pipeline_mode."""
    configs = [
        dict(single_buffer_weights=True, deep_x_buffering=True),
        dict(single_buffer_weights=True, deep_x_buffering=False),
        dict(single_buffer_weights=False, deep_x_buffering=False),
    ]
    last_err = None
    for cfg in configs:
        try:
            out = jax.block_until_ready(multi_head_differential_attention(
                x, params, num_heads=num_heads, mxu_dtype=mxu_dtype, **cfg))
        except Exception as e:  # noqa: BLE001 - fall back to the safe config
            last_err = e
            continue
        if jnp.allclose(out, ref, atol=atol, rtol=rtol):
            return out
        last_err = AssertionError("kernel output mismatch vs JAX reference")
    raise last_err


if __name__ == "__main__":
    # Small shapes consistent with the module: d_model=32, num_heads=2 -> d_head=8,
    # seq=8 (so the PyTorch lambda broadcast is well-defined), batch=2.
    B, S, d_model, num_heads = 2, 8, 32, 2
    d_head = d_model // (2 * num_heads)
    two_d = 2 * d_model

    key = jax.random.PRNGKey(0)
    keys = jax.random.split(key, 12)

    def linear_init(kw, kb, fan_in, fan_out):
        bound = 1.0 / (fan_in ** 0.5)
        w = jax.random.uniform(kw, (fan_in, fan_out), jnp.float32, -bound, bound)
        b = jax.random.uniform(kb, (1, fan_out), jnp.float32, -bound, bound)
        return w, b

    wq, bq = linear_init(keys[0], keys[1], d_model, two_d)
    wk, bk = linear_init(keys[2], keys[3], d_model, two_d)
    wv, bv = linear_init(keys[4], keys[5], d_model, two_d)
    params = {
        "wq": wq, "bq": bq, "wk": wk, "bk": bk, "wv": wv, "bv": bv,
        # torch.rand -> uniform [0, 1), shape (d_head,), kept 2D for TPU layout.
        "lambda_q1": jax.random.uniform(keys[6], (1, d_head), jnp.float32),
        "lambda_k1": jax.random.uniform(keys[7], (1, d_head), jnp.float32),
        "lambda_q2": jax.random.uniform(keys[8], (1, d_head), jnp.float32),
        "lambda_k2": jax.random.uniform(keys[9], (1, d_head), jnp.float32),
    }

    x = jax.random.normal(keys[10], (B, S, d_model), jnp.float32)
    ref = _reference(x, params, num_heads=num_heads)

    # f32 MXU path: tight-ish check (approx reciprocal + reassociation slack).
    out_f32 = _run_and_check(x, params, num_heads=num_heads,
                             mxu_dtype=jnp.float32, atol=5e-3, rtol=5e-3, ref=ref)
    assert out_f32.shape == (B, S, two_d)

    # bf16 MXU operands everywhere (f32 accumulation): re-baselined looser tolerance.
    out_bf16 = _run_and_check(x, params, num_heads=num_heads,
                              mxu_dtype=jnp.bfloat16, atol=5e-2, rtol=5e-2, ref=ref)
    assert out_bf16.shape == (B, S, two_d)

    print("KERNEL_OK")
</pallas_src>

<mosaic_0001>
module attributes {stable_mosaic.version = 11 : i64} {
  func.func @_diff_attn_kernel(%arg0: i32, %arg1: memref<16x32xf32, #tpu.memory_space<vmem>>, %arg2: memref<32x32xf32, #tpu.memory_space<vmem>>, %arg3: memref<32x32xf32, #tpu.memory_space<vmem>>, %arg4: memref<32x32xf32, #tpu.memory_space<vmem>>, %arg5: memref<32x32xf32, #tpu.memory_space<vmem>>, %arg6: memref<32x128xf32, #tpu.memory_space<vmem>>, %arg7: memref<1x32xf32, #tpu.memory_space<vmem>>, %arg8: memref<1x32xf32, #tpu.memory_space<vmem>>, %arg9: memref<1x32xf32, #tpu.memory_space<vmem>>, %arg10: memref<1x32xf32, #tpu.memory_space<vmem>>, %arg11: memref<1x128xf32, #tpu.memory_space<vmem>>, %arg12: memref<1x8xf32, #tpu.memory_space<vmem>>, %arg13: memref<16x128xf32, #tpu.memory_space<vmem>>) attributes {dimension_semantics = [#tpu.dimension_semantics<parallel>], iteration_bounds = array<i64: 1>, scalar_prefetch = 0 : i64, scratch_operands = 0 : i64, tpu.core_type = #tpu.core_type<tc>, window_params = [{transform_indices = @transform_0, window_bounds = array<i64: 16, 32>}, {pipeline_mode = #tpu.pipeline_mode<synchronous>, transform_indices = @transform_1, window_bounds = array<i64: 32, 32>}, {pipeline_mode = #tpu.pipeline_mode<synchronous>, transform_indices = @transform_2, window_bounds = array<i64: 32, 32>}, {pipeline_mode = #tpu.pipeline_mode<synchronous>, transform_indices = @transform_3, window_bounds = array<i64: 32, 32>}, {pipeline_mode = #tpu.pipeline_mode<synchronous>, transform_indices = @transform_4, window_bounds = array<i64: 32, 32>}, {pipeline_mode = #tpu.pipeline_mode<synchronous>, transform_indices = @transform_5, window_bounds = array<i64: 32, 128>}, {pipeline_mode = #tpu.pipeline_mode<synchronous>, transform_indices = @transform_6, window_bounds = array<i64: 1, 32>}, {pipeline_mode = #tpu.pipeline_mode<synchronous>, transform_indices = @transform_7, window_bounds = array<i64: 1, 32>}, {pipeline_mode = #tpu.pipeline_mode<synchronous>, transform_indices = @transform_8, window_bounds = array<i64: 1, 32>}, {pipeline_mode = #tpu.pipeline_mode<synchronous>, transform_indices = @transform_9, window_bounds = array<i64: 1, 32>}, {pipeline_mode = #tpu.pipeline_mode<synchronous>, transform_indices = @transform_10, window_bounds = array<i64: 1, 128>}, {pipeline_mode = #tpu.pipeline_mode<synchronous>, transform_indices = @transform_11, window_bounds = array<i64: 1, 8>}, {transform_indices = @transform_12, window_bounds = array<i64: 16, 128>}]} {
    %c0 = arith.constant 0 : index
    %c0_0 = arith.constant 0 : index
    %0 = vector.load %arg1[%c0, %c0_0] : memref<16x32xf32, #tpu.memory_space<vmem>>, vector<16x32xf32>
    %c0_1 = arith.constant 0 : index
    %c0_2 = arith.constant 0 : index
    %1 = vector.load %arg2[%c0_1, %c0_2] : memref<32x32xf32, #tpu.memory_space<vmem>>, vector<32x32xf32>
    %cst = arith.constant dense<0.000000e+00> : vector<16x32xf32>
    %2 = tpu.matmul %0, %1, %cst {dimension_numbers = #tpu.dot_dimension_numbers<[1], [0], [0], [1], [0, 0, 1, 1], [], []>} : vector<16x32xf32>, vector<32x32xf32>, vector<16x32xf32> -> vector<16x32xf32>
    %c0_3 = arith.constant 0 : index
    %c0_4 = arith.constant 0 : index
    %3 = vector.load %arg7[%c0_3, %c0_4] : memref<1x32xf32, #tpu.memory_space<vmem>>, vector<1x32xf32>
    %4 = vector.broadcast %3 : vector<1x32xf32> to vector<16x32xf32>
    %5 = arith.addf %2, %4 : vector<16x32xf32>
    %6 = vector.shape_cast %5 : vector<16x32xf32> to vector<2x8x32xf32>
    %c0_5 = arith.constant 0 : index
    %c0_6 = arith.constant 0 : index
    %7 = vector.load %arg3[%c0_5, %c0_6] : memref<32x32xf32, #tpu.memory_space<vmem>>, vector<32x32xf32>
    %cst_7 = arith.constant dense<0.000000e+00> : vector<16x32xf32>
    %8 = tpu.matmul %0, %7, %cst_7 {dimension_numbers = #tpu.dot_dimension_numbers<[1], [0], [0], [1], [0, 0, 1, 1], [], []>} : vector<16x32xf32>, vector<32x32xf32>, vector<16x32xf32> -> vector<16x32xf32>
    %c0_8 = arith.constant 0 : index
    %c0_9 = arith.constant 0 : index
    %9 = vector.load %arg8[%c0_8, %c0_9] : memref<1x32xf32, #tpu.memory_space<vmem>>, vector<1x32xf32>
    %10 = vector.broadcast %9 : vector<1x32xf32> to vector<16x32xf32>
    %11 = arith.addf %8, %10 : vector<16x32xf32>
    %12 = vector.shape_cast %11 : vector<16x32xf32> to vector<2x8x32xf32>
    %c0_10 = arith.constant 0 : index
    %c0_11 = arith.constant 0 : index
    %13 = vector.load %arg4[%c0_10, %c0_11] : memref<32x32xf32, #tpu.memory_space<vmem>>, vector<32x32xf32>
    %cst_12 = arith.constant dense<0.000000e+00> : vector<16x32xf32>
    %14 = tpu.matmul %0, %13, %cst_12 {dimension_numbers = #tpu.dot_dimension_numbers<[1], [0], [0], [1], [0, 0, 1, 1], [], []>} : vector<16x32xf32>, vector<32x32xf32>, vector<16x32xf32> -> vector<16x32xf32>
    %c0_13 = arith.constant 0 : index
    %c0_14 = arith.constant 0 : index
    %15 = vector.load %arg9[%c0_13, %c0_14] : memref<1x32xf32, #tpu.memory_space<vmem>>, vector<1x32xf32>
    %16 = vector.broadcast %15 : vector<1x32xf32> to vector<16x32xf32>
    %17 = arith.addf %14, %16 : vector<16x32xf32>
    %18 = vector.shape_cast %17 : vector<16x32xf32> to vector<2x8x32xf32>
    %c0_15 = arith.constant 0 : index
    %c0_16 = arith.constant 0 : index
    %19 = vector.load %arg5[%c0_15, %c0_16] : memref<32x32xf32, #tpu.memory_space<vmem>>, vector<32x32xf32>
    %cst_17 = arith.constant dense<0.000000e+00> : vector<16x32xf32>
    %20 = tpu.matmul %0, %19, %cst_17 {dimension_numbers = #tpu.dot_dimension_numbers<[1], [0], [0], [1], [0, 0, 1, 1], [], []>} : vector<16x32xf32>, vector<32x32xf32>, vector<16x32xf32> -> vector<16x32xf32>
    %c0_18 = arith.constant 0 : index
    %c0_19 = arith.constant 0 : index
    %21 = vector.load %arg10[%c0_18, %c0_19] : memref<1x32xf32, #tpu.memory_space<vmem>>, vector<1x32xf32>
    %22 = vector.broadcast %21 : vector<1x32xf32> to vector<16x32xf32>
    %23 = arith.addf %20, %22 : vector<16x32xf32>
    %24 = vector.shape_cast %23 : vector<16x32xf32> to vector<2x8x32xf32>
    %c0_20 = arith.constant 0 : index
    %c0_21 = arith.constant 0 : index
    %25 = vector.load %arg6[%c0_20, %c0_21] : memref<32x128xf32, #tpu.memory_space<vmem>>, vector<32x128xf32>
    %cst_22 = arith.constant dense<0.000000e+00> : vector<16x128xf32>
    %26 = tpu.matmul %0, %25, %cst_22 {dimension_numbers = #tpu.dot_dimension_numbers<[1], [0], [0], [1], [0, 0, 1, 1], [], []>} : vector<16x32xf32>, vector<32x128xf32>, vector<16x128xf32> -> vector<16x128xf32>
    %c0_23 = arith.constant 0 : index
    %c0_24 = arith.constant 0 : index
    %27 = vector.load %arg11[%c0_23, %c0_24] : memref<1x128xf32, #tpu.memory_space<vmem>>, vector<1x128xf32>
    %28 = vector.broadcast %27 : vector<1x128xf32> to vector<16x128xf32>
    %29 = arith.addf %26, %28 : vector<16x128xf32>
    %30 = vector.shape_cast %29 : vector<16x128xf32> to vector<2x8x128xf32>
    %cst_25 = arith.constant dense<0.000000e+00> : vector<2x8x8xf32>
    %31 = tpu.matmul %6, %18, %cst_25 {dimension_numbers = #tpu.dot_dimension_numbers<[2], [2], [1], [1], [0, 0, 0, 1, 1, 1], [0], [0]>} : vector<2x8x32xf32>, vector<2x8x32xf32>, vector<2x8x8xf32> -> vector<2x8x8xf32>
    %cst_26 = arith.constant dense<0.000000e+00> : vector<2x8x8xf32>
    %32 = tpu.matmul %12, %24, %cst_26 {dimension_numbers = #tpu.dot_dimension_numbers<[2], [2], [1], [1], [0, 0, 0, 1, 1, 1], [0], [0]>} : vector<2x8x32xf32>, vector<2x8x32xf32>, vector<2x8x8xf32> -> vector<2x8x8xf32>
    %cst_27 = arith.constant dense<0xFF800000> : vector<2x8xf32>
    %33 = vector.multi_reduction <maximumf>, %31, %cst_27 [2] : vector<2x8x8xf32> to vector<2x8xf32>
    %34 = vector.shape_cast %33 : vector<2x8xf32> to vector<2x8x1xf32>
    %35 = vector.broadcast %34 : vector<2x8x1xf32> to vector<2x8x8xf32>
    %36 = arith.subf %31, %35 : vector<2x8x8xf32>
    %37 = math.exp %36 : vector<2x8x8xf32>
    %cst_28 = arith.constant dense<0.000000e+00> : vector<2x8xf32>
    %38 = vector.multi_reduction <add>, %37, %cst_28 [2] : vector<2x8x8xf32> to vector<2x8xf32>
    %39 = vector.shape_cast %38 : vector<2x8xf32> to vector<2x8x1xf32>
    %40 = tpu.reciprocal %39 {approx = true} : vector<2x8x1xf32> -> vector<2x8x1xf32>
    %41 = vector.broadcast %40 : vector<2x8x1xf32> to vector<2x8x8xf32>
    %42 = arith.mulf %37, %41 : vector<2x8x8xf32>
    %cst_29 = arith.constant dense<0xFF800000> : vector<2x8xf32>
    %43 = vector.multi_reduction <maximumf>, %32, %cst_29 [2] : vector<2x8x8xf32> to vector<2x8xf32>
    %44 = vector.shape_cast %43 : vector<2x8xf32> to vector<2x8x1xf32>
    %45 = vector.broadcast %44 : vector<2x8x1xf32> to vector<2x8x8xf32>
    %46 = arith.subf %32, %45 : vector<2x8x8xf32>
    %47 = math.exp %46 : vector<2x8x8xf32>
    %cst_30 = arith.constant dense<0.000000e+00> : vector<2x8xf32>
    %48 = vector.multi_reduction <add>, %47, %cst_30 [2] : vector<2x8x8xf32> to vector<2x8xf32>
    %49 = vector.shape_cast %48 : vector<2x8xf32> to vector<2x8x1xf32>
    %50 = tpu.reciprocal %49 {approx = true} : vector<2x8x1xf32> -> vector<2x8x1xf32>
    %51 = vector.broadcast %50 : vector<2x8x1xf32> to vector<2x8x8xf32>
    %52 = arith.mulf %47, %51 : vector<2x8x8xf32>
    %c0_31 = arith.constant 0 : index
    %c0_32 = arith.constant 0 : index
    %53 = vector.load %arg12[%c0_31, %c0_32] : memref<1x8xf32, #tpu.memory_space<vmem>>, vector<1x8xf32>
    %54 = vector.shape_cast %53 : vector<1x8xf32> to vector<1x1x8xf32>
    %55 = vector.broadcast %54 : vector<1x1x8xf32> to vector<2x8x8xf32>
    %56 = arith.mulf %55, %52 : vector<2x8x8xf32>
    %57 = arith.subf %42, %56 : vector<2x8x8xf32>
    %cst_33 = arith.constant dense<0.000000e+00> : vector<2x8x128xf32>
    %58 = tpu.matmul %57, %30, %cst_33 {dimension_numbers = #tpu.dot_dimension_numbers<[2], [1], [1], [2], [0, 0, 0, 1, 1, 2], [0], [0]>} : vector<2x8x8xf32>, vector<2x8x128xf32>, vector<2x8x128xf32> -> vector<2x8x128xf32>
    %59 = vector.shape_cast %58 : vector<2x8x128xf32> to vector<16x128xf32>
    %c0_34 = arith.constant 0 : index
    %c0_35 = arith.constant 0 : index
    %60 = vector.load %arg13[%c0_34, %c0_35] : memref<16x128xf32, #tpu.memory_space<vmem>>, vector<16x128xf32>
    tpu.vector_store %arg13[%c0_34, %c0_35], %59 {strides = array<i32>} : memref<16x128xf32, #tpu.memory_space<vmem>>, vector<16x128xf32>,
    return
  }
  func.func @transform_0(%arg0: i32) -> (i32, i32) {
    %c0_i32 = arith.constant 0 : i32
    %c0_i32_0 = arith.constant 0 : i32
    return %arg0, %c0_i32 : i32, i32
  }
  func.func @transform_1(%arg0: i32) -> (i32, i32) {
    %c0_i32 = arith.constant 0 : i32
    %c0_i32_0 = arith.constant 0 : i32
    %c0_i32_1 = arith.constant 0 : i32
    return %c0_i32, %c0_i32_0 : i32, i32
  }
  func.func @transform_2(%arg0: i32) -> (i32, i32) {
    %c0_i32 = arith.constant 0 : i32
    %c0_i32_0 = arith.constant 0 : i32
    %c0_i32_1 = arith.constant 0 : i32
    return %c0_i32, %c0_i32_0 : i32, i32
  }
  func.func @transform_3(%arg0: i32) -> (i32, i32) {
    %c0_i32 = arith.constant 0 : i32
    %c0_i32_0 = arith.constant 0 : i32
    %c0_i32_1 = arith.constant 0 : i32
    return %c0_i32, %c0_i32_0 : i32, i32
  }
  func.func @transform_4(%arg0: i32) -> (i32, i32) {
    %c0_i32 = arith.constant 0 : i32
    %c0_i32_0 = arith.constant 0 : i32
    %c0_i32_1 = arith.constant 0 : i32
    return %c0_i32, %c0_i32_0 : i32, i32
  }
  func.func @transform_5(%arg0: i32) -> (i32, i32) {
    %c0_i32 = arith.constant 0 : i32
    %c0_i32_0 = arith.constant 0 : i32
    %c0_i32_1 = arith.constant 0 : i32
    return %c0_i32, %c0_i32_0 : i32, i32
  }
  func.func @transform_6(%arg0: i32) -> (i32, i32) {
    %c0_i32 = arith.constant 0 : i32
    %c0_i32_0 = arith.constant 0 : i32
    %c0_i32_1 = arith.constant 0 : i32
    return %c0_i32, %c0_i32_0 : i32, i32
  }
  func.func @transform_7(%arg0: i32) -> (i32, i32) {
    %c0_i32 = arith.constant 0 : i32
    %c0_i32_0 = arith.constant 0 : i32
    %c0_i32_1 = arith.constant 0 : i32
    return %c0_i32, %c0_i32_0 : i32, i32
  }
  func.func @transform_8(%arg0: i32) -> (i32, i32) {
    %c0_i32 = arith.constant 0 : i32
    %c0_i32_0 = arith.constant 0 : i32
    %c0_i32_1 = arith.constant 0 : i32
    return %c0_i32, %c0_i32_0 : i32, i32
  }
  func.func @transform_9(%arg0: i32) -> (i32, i32) {
    %c0_i32 = arith.constant 0 : i32
    %c0_i32_0 = arith.constant 0 : i32
    %c0_i32_1 = arith.constant 0 : i32
    return %c0_i32, %c0_i32_0 : i32, i32
  }
  func.func @transform_10(%arg0: i32) -> (i32, i32) {
    %c0_i32 = arith.constant 0 : i32
    %c0_i32_0 = arith.constant 0 : i32
    %c0_i32_1 = arith.constant 0 : i32
    return %c0_i32, %c0_i32_0 : i32, i32
  }
  func.func @transform_11(%arg0: i32) -> (i32, i32) {
    %c0_i32 = arith.constant 0 : i32
    %c0_i32_0 = arith.constant 0 : i32
    %c0_i32_1 = arith.constant 0 : i32
    return %c0_i32, %c0_i32_0 : i32, i32
  }
  func.func @transform_12(%arg0: i32) -> (i32, i32) {
    %c0_i32 = arith.constant 0 : i32
    %c0_i32_0 = arith.constant 0 : i32
    return %arg0, %c0_i32 : i32, i32
  }
}

module attributes {stable_mosaic.version = 11 : i64} {
  func.func @_diff_attn_kernel(%arg0: i32, %arg1: memref<16x32xf32, #tpu.memory_space<vmem>>, %arg2: memref<32x32xf32, #tpu.memory_space<vmem>>, %arg3: memref<32x32xf32, #tpu.memory_space<vmem>>, %arg4: memref<32x32xf32, #tpu.memory_space<vmem>>, %arg5: memref<32x32xf32, #tpu.memory_space<vmem>>, %arg6: memref<32x128xf32, #tpu.memory_space<vmem>>, %arg7: memref<1x32xf32, #tpu.memory_space<vmem>>, %arg8: memref<1x32xf32, #tpu.memory_space<vmem>>, %arg9: memref<1x32xf32, #tpu.memory_space<vmem>>, %arg10: memref<1x32xf32, #tpu.memory_space<vmem>>, %arg11: memref<1x128xf32, #tpu.memory_space<vmem>>, %arg12: memref<1x8xf32, #tpu.memory_space<vmem>>, %arg13: memref<16x128xf32, #tpu.memory_space<vmem>>) attributes {dimension_semantics = [#tpu.dimension_semantics<parallel>], iteration_bounds = array<i64: 1>, scalar_prefetch = 0 : i64, scratch_operands = 0 : i64, tpu.core_type = #tpu.core_type<tc>, window_params = [{transform_indices = @transform_0, window_bounds = array<i64: 16, 32>}, {pipeline_mode = #tpu.pipeline_mode<synchronous>, transform_indices = @transform_1, window_bounds = array<i64: 32, 32>}, {pipeline_mode = #tpu.pipeline_mode<synchronous>, transform_indices = @transform_2, window_bounds = array<i64: 32, 32>}, {pipeline_mode = #tpu.pipeline_mode<synchronous>, transform_indices = @transform_3, window_bounds = array<i64: 32, 32>}, {pipeline_mode = #tpu.pipeline_mode<synchronous>, transform_indices = @transform_4, window_bounds = array<i64: 32, 32>}, {pipeline_mode = #tpu.pipeline_mode<synchronous>, transform_indices = @transform_5, window_bounds = array<i64: 32, 128>}, {pipeline_mode = #tpu.pipeline_mode<synchronous>, transform_indices = @transform_6, window_bounds = array<i64: 1, 32>}, {pipeline_mode = #tpu.pipeline_mode<synchronous>, transform_indices = @transform_7, window_bounds = array<i64: 1, 32>}, {pipeline_mode = #tpu.pipeline_mode<synchronous>, transform_indices = @transform_8, window_bounds = array<i64: 1, 32>}, {pipeline_mode = #tpu.pipeline_mode<synchronous>, transform_indices = @transform_9, window_bounds = array<i64: 1, 32>}, {pipeline_mode = #tpu.pipeline_mode<synchronous>, transform_indices = @transform_10, window_bounds = array<i64: 1, 128>}, {pipeline_mode = #tpu.pipeline_mode<synchronous>, transform_indices = @transform_11, window_bounds = array<i64: 1, 8>}, {transform_indices = @transform_12, window_bounds = array<i64: 16, 128>}]} {
    %c0 = arith.constant 0 : index
    %c0_0 = arith.constant 0 : index
    %0 = vector.load %arg1[%c0, %c0_0] : memref<16x32xf32, #tpu.memory_space<vmem>>, vector<16x32xf32>
    %c0_1 = arith.constant 0 : index
    %c0_2 = arith.constant 0 : index
    %1 = vector.load %arg2[%c0_1, %c0_2] : memref<32x32xf32, #tpu.memory_space<vmem>>, vector<32x32xf32>
    %cst = arith.constant dense<0.000000e+00> : vector<16x32xf32>
    %2 = tpu.matmul %0, %1, %cst {dimension_numbers = #tpu.dot_dimension_numbers<[1], [0], [0], [1], [0, 0, 1, 1], [], []>} : vector<16x32xf32>, vector<32x32xf32>, vector<16x32xf32> -> vector<16x32xf32>
    %c0_3 = arith.constant 0 : index
    %c0_4 = arith.constant 0 : index
    %3 = vector.load %arg7[%c0_3, %c0_4] : memref<1x32xf32, #tpu.memory_space<vmem>>, vector<1x32xf32>
    %4 = vector.broadcast %3 : vector<1x32xf32> to vector<16x32xf32>
    %5 = arith.addf %2, %4 : vector<16x32xf32>
    %6 = vector.shape_cast %5 : vector<16x32xf32> to vector<2x8x32xf32>
    %c0_5 = arith.constant 0 : index
    %c0_6 = arith.constant 0 : index
    %7 = vector.load %arg3[%c0_5, %c0_6] : memref<32x32xf32, #tpu.memory_space<vmem>>, vector<32x32xf32>
    %cst_7 = arith.constant dense<0.000000e+00> : vector<16x32xf32>
    %8 = tpu.matmul %0, %7, %cst_7 {dimension_numbers = #tpu.dot_dimension_numbers<[1], [0], [0], [1], [0, 0, 1, 1], [], []>} : vector<16x32xf32>, vector<32x32xf32>, vector<16x32xf32> -> vector<16x32xf32>
    %c0_8 = arith.constant 0 : index
    %c0_9 = arith.constant 0 : index
    %9 = vector.load %arg8[%c0_8, %c0_9] : memref<1x32xf32, #tpu.memory_space<vmem>>, vector<1x32xf32>
    %10 = vector.broadcast %9 : vector<1x32xf32> to vector<16x32xf32>
    %11 = arith.addf %8, %10 : vector<16x32xf32>
    %12 = vector.shape_cast %11 : vector<16x32xf32> to vector<2x8x32xf32>
    %c0_10 = arith.constant 0 : index
    %c0_11 = arith.constant 0 : index
    %13 = vector.load %arg4[%c0_10, %c0_11] : memref<32x32xf32, #tpu.memory_space<vmem>>, vector<32x32xf32>
    %cst_12 = arith.constant dense<0.000000e+00> : vector<16x32xf32>
    %14 = tpu.matmul %0, %13, %cst_12 {dimension_numbers = #tpu.dot_dimension_numbers<[1], [0], [0], [1], [0, 0, 1, 1], [], []>} : vector<16x32xf32>, vector<32x32xf32>, vector<16x32xf32> -> vector<16x32xf32>
    %c0_13 = arith.constant 0 : index
    %c0_14 = arith.constant 0 : index
    %15 = vector.load %arg9[%c0_13, %c0_14] : memref<1x32xf32, #tpu.memory_space<vmem>>, vector<1x32xf32>
    %16 = vector.broadcast %15 : vector<1x32xf32> to vector<16x32xf32>
    %17 = arith.addf %14, %16 : vector<16x32xf32>
    %18 = vector.shape_cast %17 : vector<16x32xf32> to vector<2x8x32xf32>
    %c0_15 = arith.constant 0 : index
    %c0_16 = arith.constant 0 : index
    %19 = vector.load %arg5[%c0_15, %c0_16] : memref<32x32xf32, #tpu.memory_space<vmem>>, vector<32x32xf32>
    %cst_17 = arith.constant dense<0.000000e+00> : vector<16x32xf32>
    %20 = tpu.matmul %0, %19, %cst_17 {dimension_numbers = #tpu.dot_dimension_numbers<[1], [0], [0], [1], [0, 0, 1, 1], [], []>} : vector<16x32xf32>, vector<32x32xf32>, vector<16x32xf32> -> vector<16x32xf32>
    %c0_18 = arith.constant 0 : index
    %c0_19 = arith.constant 0 : index
    %21 = vector.load %arg10[%c0_18, %c0_19] : memref<1x32xf32, #tpu.memory_space<vmem>>, vector<1x32xf32>
    %22 = vector.broadcast %21 : vector<1x32xf32> to vector<16x32xf32>
    %23 = arith.addf %20, %22 : vector<16x32xf32>
    %24 = vector.shape_cast %23 : vector<16x32xf32> to vector<2x8x32xf32>
    %c0_20 = arith.constant 0 : index
    %c0_21 = arith.constant 0 : index
    %25 = vector.load %arg6[%c0_20, %c0_21] : memref<32x128xf32, #tpu.memory_space<vmem>>, vector<32x128xf32>
    %cst_22 = arith.constant dense<0.000000e+00> : vector<16x128xf32>
    %26 = tpu.matmul %0, %25, %cst_22 {dimension_numbers = #tpu.dot_dimension_numbers<[1], [0], [0], [1], [0, 0, 1, 1], [], []>} : vector<16x32xf32>, vector<32x128xf32>, vector<16x128xf32> -> vector<16x128xf32>
    %c0_23 = arith.constant 0 : index
    %c0_24 = arith.constant 0 : index
    %27 = vector.load %arg11[%c0_23, %c0_24] : memref<1x128xf32, #tpu.memory_space<vmem>>, vector<1x128xf32>
    %28 = vector.broadcast %27 : vector<1x128xf32> to vector<16x128xf32>
    %29 = arith.addf %26, %28 : vector<16x128xf32>
    %30 = vector.shape_cast %29 : vector<16x128xf32> to vector<2x8x128xf32>
    %cst_25 = arith.constant dense<0.000000e+00> : vector<2x8x8xf32>
    %31 = tpu.matmul %6, %18, %cst_25 {dimension_numbers = #tpu.dot_dimension_numbers<[2], [2], [1], [1], [0, 0, 0, 1, 1, 1], [0], [0]>} : vector<2x8x32xf32>, vector<2x8x32xf32>, vector<2x8x8xf32> -> vector<2x8x8xf32>
    %cst_26 = arith.constant dense<0.000000e+00> : vector<2x8x8xf32>
    %32 = tpu.matmul %12, %24, %cst_26 {dimension_numbers = #tpu.dot_dimension_numbers<[2], [2], [1], [1], [0, 0, 0, 1, 1, 1], [0], [0]>} : vector<2x8x32xf32>, vector<2x8x32xf32>, vector<2x8x8xf32> -> vector<2x8x8xf32>
    %cst_27 = arith.constant dense<0xFF800000> : vector<2x8xf32>
    %33 = vector.multi_reduction <maximumf>, %31, %cst_27 [2] : vector<2x8x8xf32> to vector<2x8xf32>
    %34 = vector.shape_cast %33 : vector<2x8xf32> to vector<2x8x1xf32>
    %35 = vector.broadcast %34 : vector<2x8x1xf32> to vector<2x8x8xf32>
    %36 = arith.subf %31, %35 : vector<2x8x8xf32>
    %37 = math.exp %36 : vector<2x8x8xf32>
    %cst_28 = arith.constant dense<0.000000e+00> : vector<2x8xf32>
    %38 = vector.multi_reduction <add>, %37, %cst_28 [2] : vector<2x8x8xf32> to vector<2x8xf32>
    %39 = vector.shape_cast %38 : vector<2x8xf32> to vector<2x8x1xf32>
    %40 = tpu.reciprocal %39 {approx = true} : vector<2x8x1xf32> -> vector<2x8x1xf32>
    %41 = vector.broadcast %40 : vector<2x8x1xf32> to vector<2x8x8xf32>
    %42 = arith.mulf %37, %41 : vector<2x8x8xf32>
    %cst_29 = arith.constant dense<0xFF800000> : vector<2x8xf32>
    %43 = vector.multi_reduction <maximumf>, %32, %cst_29 [2] : vector<2x8x8xf32> to vector<2x8xf32>
    %44 = vector.shape_cast %43 : vector<2x8xf32> to vector<2x8x1xf32>
    %45 = vector.broadcast %44 : vector<2x8x1xf32> to vector<2x8x8xf32>
    %46 = arith.subf %32, %45 : vector<2x8x8xf32>
    %47 = math.exp %46 : vector<2x8x8xf32>
    %cst_30 = arith.constant dense<0.000000e+00> : vector<2x8xf32>
    %48 = vector.multi_reduction <add>, %47, %cst_30 [2] : vector<2x8x8xf32> to vector<2x8xf32>
    %49 = vector.shape_cast %48 : vector<2x8xf32> to vector<2x8x1xf32>
    %50 = tpu.reciprocal %49 {approx = true} : vector<2x8x1xf32> -> vector<2x8x1xf32>
    %51 = vector.broadcast %50 : vector<2x8x1xf32> to vector<2x8x8xf32>
    %52 = arith.mulf %47, %51 : vector<2x8x8xf32>
    %c0_31 = arith.constant 0 : index
    %c0_32 = arith.constant 0 : index
    %53 = vector.load %arg12[%c0_31, %c0_32] : memref<1x8xf32, #tpu.memory_space<vmem>>, vector<1x8xf32>
    %54 = vector.shape_cast %53 : vector<1x8xf32> to vector<1x1x8xf32>
    %55 = vector.broadcast %54 : vector<1x1x8xf32> to vector<2x8x8xf32>
    %56 = arith.mulf %55, %52 : vector<2x8x8xf32>
    %57 = arith.subf %42, %56 : vector<2x8x8xf32>
    %cst_33 = arith.constant dense<0.000000e+00> : vector<2x8x128xf32>
    %58 = tpu.matmul %57, %30, %cst_33 {dimension_numbers = #tpu.dot_dimension_numbers<[2], [1], [1], [2], [0, 0, 0, 1, 1, 2], [0], [0]>} : vector<2x8x8xf32>, vector<2x8x128xf32>, vector<2x8x128xf32> -> vector<2x8x128xf32>
    %59 = vector.shape_cast %58 : vector<2x8x128xf32> to vector<16x128xf32>
    %c0_34 = arith.constant 0 : index
    %c0_35 = arith.constant 0 : index
    %60 = vector.load %arg13[%c0_34, %c0_35] : memref<16x128xf32, #tpu.memory_space<vmem>>, vector<16x128xf32>
    tpu.vector_store %arg13[%c0_34, %c0_35], %59 {strides = array<i32>} : memref<16x128xf32, #tpu.memory_space<vmem>>, vector<16x128xf32>,
    return
  }
  func.func @transform_0(%arg0: i32) -> (i32, i32) {
    %c0_i32 = arith.constant 0 : i32
    %c0_i32_0 = arith.constant 0 : i32
    return %arg0, %c0_i32 : i32, i32
  }
  func.func @transform_1(%arg0: i32) -> (i32, i32) {
    %c0_i32 = arith.constant 0 : i32
    %c0_i32_0 = arith.constant 0 : i32
    %c0_i32_1 = arith.constant 0 : i32
    return %c0_i32, %c0_i32_0 : i32, i32
  }
  func.func @transform_2(%arg0: i32) -> (i32, i32) {
    %c0_i32 = arith.constant 0 : i32
    %c0_i32_0 = arith.constant 0 : i32
    %c0_i32_1 = arith.constant 0 : i32
    return %c0_i32, %c0_i32_0 : i32, i32
  }
  func.func @transform_3(%arg0: i32) -> (i32, i32) {
    %c0_i32 = arith.constant 0 : i32
    %c0_i32_0 = arith.constant 0 : i32
    %c0_i32_1 = arith.constant 0 : i32
    return %c0_i32, %c0_i32_0 : i32, i32
  }
  func.func @transform_4(%arg0: i32) -> (i32, i32) {
    %c0_i32 = arith.constant 0 : i32
    %c0_i32_0 = arith.constant 0 : i32
    %c0_i32_1 = arith.constant 0 : i32
    return %c0_i32, %c0_i32_0 : i32, i32
  }
  func.func @transform_5(%arg0: i32) -> (i32, i32) {
    %c0_i32 = arith.constant 0 : i32
    %c0_i32_0 = arith.constant 0 : i32
    %c0_i32_1 = arith.constant 0 : i32
    return %c0_i32, %c0_i32_0 : i32, i32
  }
  func.func @transform_6(%arg0: i32) -> (i32, i32) {
    %c0_i32 = arith.constant 0 : i32
    %c0_i32_0 = arith.constant 0 : i32
    %c0_i32_1 = arith.constant 0 : i32
    return %c0_i32, %c0_i32_0 : i32, i32
  }
  func.func @transform_7(%arg0: i32) -> (i32, i32) {
    %c0_i32 = arith.constant 0 : i32
    %c0_i32_0 = arith.constant 0 : i32
    %c0_i32_1 = arith.constant 0 : i32
    return %c0_i32, %c0_i32_0 : i32, i32
  }
  func.func @transform_8(%arg0: i32) -> (i32, i32) {
    %c0_i32 = arith.constant 0 : i32
    %c0_i32_0 = arith.constant 0 : i32
    %c0_i32_1 = arith.constant 0 : i32
    return %c0_i32, %c0_i32_0 : i32, i32
  }
  func.func @transform_9(%arg0: i32) -> (i32, i32) {
    %c0_i32 = arith.constant 0 : i32
    %c0_i32_0 = arith.constant 0 : i32
    %c0_i32_1 = arith.constant 0 : i32
    return %c0_i32, %c0_i32_0 : i32, i32
  }
  func.func @transform_10(%arg0: i32) -> (i32, i32) {
    %c0_i32 = arith.constant 0 : i32
    %c0_i32_0 = arith.constant 0 : i32
    %c0_i32_1 = arith.constant 0 : i32
    return %c0_i32, %c0_i32_0 : i32, i32
  }
  func.func @transform_11(%arg0: i32) -> (i32, i32) {
    %c0_i32 = arith.constant 0 : i32
    %c0_i32_0 = arith.constant 0 : i32
    %c0_i32_1 = arith.constant 0 : i32
    return %c0_i32, %c0_i32_0 : i32, i32
  }
  func.func @transform_12(%arg0: i32) -> (i32, i32) {
    %c0_i32 = arith.constant 0 : i32
    %c0_i32_0 = arith.constant 0 : i32
    return %arg0, %c0_i32 : i32, i32
  }
}

module attributes {stable_mosaic.version = 11 : i64} {
  func.func @_diff_attn_kernel(%arg0: i32, %arg1: memref<16x32xf32, #tpu.memory_space<vmem>>, %arg2: memref<32x32xf32, #tpu.memory_space<vmem>>, %arg3: memref<32x32xf32, #tpu.memory_space<vmem>>, %arg4: memref<32x32xf32, #tpu.memory_space<vmem>>, %arg5: memref<32x32xf32, #tpu.memory_space<vmem>>, %arg6: memref<32x128xf32, #tpu.memory_space<vmem>>, %arg7: memref<1x32xf32, #tpu.memory_space<vmem>>, %arg8: memref<1x32xf32, #tpu.memory_space<vmem>>, %arg9: memref<1x32xf32, #tpu.memory_space<vmem>>, %arg10: memref<1x32xf32, #tpu.memory_space<vmem>>, %arg11: memref<1x128xf32, #tpu.memory_space<vmem>>, %arg12: memref<1x8xf32, #tpu.memory_space<vmem>>, %arg13: memref<16x128xf32, #tpu.memory_space<vmem>>) attributes {dimension_semantics = [#tpu.dimension_semantics<parallel>], iteration_bounds = array<i64: 1>, scalar_prefetch = 0 : i64, scratch_operands = 0 : i64, tpu.core_type = #tpu.core_type<tc>, window_params = [{transform_indices = @transform_0, window_bounds = array<i64: 16, 32>}, {pipeline_mode = #tpu.pipeline_mode<synchronous>, transform_indices = @transform_1, window_bounds = array<i64: 32, 32>}, {pipeline_mode = #tpu.pipeline_mode<synchronous>, transform_indices = @transform_2, window_bounds = array<i64: 32, 32>}, {pipeline_mode = #tpu.pipeline_mode<synchronous>, transform_indices = @transform_3, window_bounds = array<i64: 32, 32>}, {pipeline_mode = #tpu.pipeline_mode<synchronous>, transform_indices = @transform_4, window_bounds = array<i64: 32, 32>}, {pipeline_mode = #tpu.pipeline_mode<synchronous>, transform_indices = @transform_5, window_bounds = array<i64: 32, 128>}, {pipeline_mode = #tpu.pipeline_mode<synchronous>, transform_indices = @transform_6, window_bounds = array<i64: 1, 32>}, {pipeline_mode = #tpu.pipeline_mode<synchronous>, transform_indices = @transform_7, window_bounds = array<i64: 1, 32>}, {pipeline_mode = #tpu.pipeline_mode<synchronous>, transform_indices = @transform_8, window_bounds = array<i64: 1, 32>}, {pipeline_mode = #tpu.pipeline_mode<synchronous>, transform_indices = @transform_9, window_bounds = array<i64: 1, 32>}, {pipeline_mode = #tpu.pipeline_mode<synchronous>, transform_indices = @transform_10, window_bounds = array<i64: 1, 128>}, {pipeline_mode = #tpu.pipeline_mode<synchronous>, transform_indices = @transform_11, window_bounds = array<i64: 1, 8>}, {transform_indices = @transform_12, window_bounds = array<i64: 16, 128>}]} {
    %c0 = arith.constant 0 : index
    %c0_0 = arith.constant 0 : index
    %0 = vector.load %arg1[%c0, %c0_0] : memref<16x32xf32, #tpu.memory_space<vmem>>, vector<16x32xf32>
    %c0_1 = arith.constant 0 : index
    %c0_2 = arith.constant 0 : index
    %1 = vector.load %arg2[%c0_1, %c0_2] : memref<32x32xf32, #tpu.memory_space<vmem>>, vector<32x32xf32>
    %cst = arith.constant dense<0.000000e+00> : vector<16x32xf32>
    %2 = tpu.matmul %0, %1, %cst {dimension_numbers = #tpu.dot_dimension_numbers<[1], [0], [0], [1], [0, 0, 1, 1], [], []>} : vector<16x32xf32>, vector<32x32xf32>, vector<16x32xf32> -> vector<16x32xf32>
    %c0_3 = arith.constant 0 : index
    %c0_4 = arith.constant 0 : index
    %3 = vector.load %arg7[%c0_3, %c0_4] : memref<1x32xf32, #tpu.memory_space<vmem>>, vector<1x32xf32>
    %4 = vector.broadcast %3 : vector<1x32xf32> to vector<16x32xf32>
    %5 = arith.addf %2, %4 : vector<16x32xf32>
    %6 = vector.shape_cast %5 : vector<16x32xf32> to vector<2x8x32xf32>
    %c0_5 = arith.constant 0 : index
    %c0_6 = arith.constant 0 : index
    %7 = vector.load %arg3[%c0_5, %c0_6] : memref<32x32xf32, #tpu.memory_space<vmem>>, vector<32x32xf32>
    %cst_7 = arith.constant dense<0.000000e+00> : vector<16x32xf32>
    %8 = tpu.matmul %0, %7, %cst_7 {dimension_numbers = #tpu.dot_dimension_numbers<[1], [0], [0], [1], [0, 0, 1, 1], [], []>} : vector<16x32xf32>, vector<32x32xf32>, vector<16x32xf32> -> vector<16x32xf32>
    %c0_8 = arith.constant 0 : index
    %c0_9 = arith.constant 0 : index
    %9 = vector.load %arg8[%c0_8, %c0_9] : memref<1x32xf32, #tpu.memory_space<vmem>>, vector<1x32xf32>
    %10 = vector.broadcast %9 : vector<1x32xf32> to vector<16x32xf32>
    %11 = arith.addf %8, %10 : vector<16x32xf32>
    %12 = vector.shape_cast %11 : vector<16x32xf32> to vector<2x8x32xf32>
    %c0_10 = arith.constant 0 : index
    %c0_11 = arith.constant 0 : index
    %13 = vector.load %arg4[%c0_10, %c0_11] : memref<32x32xf32, #tpu.memory_space<vmem>>, vector<32x32xf32>
    %cst_12 = arith.constant dense<0.000000e+00> : vector<16x32xf32>
    %14 = tpu.matmul %0, %13, %cst_12 {dimension_numbers = #tpu.dot_dimension_numbers<[1], [0], [0], [1], [0, 0, 1, 1], [], []>} : vector<16x32xf32>, vector<32x32xf32>, vector<16x32xf32> -> vector<16x32xf32>
    %c0_13 = arith.constant 0 : index
    %c0_14 = arith.constant 0 : index
    %15 = vector.load %arg9[%c0_13, %c0_14] : memref<1x32xf32, #tpu.memory_space<vmem>>, vector<1x32xf32>
    %16 = vector.broadcast %15 : vector<1x32xf32> to vector<16x32xf32>
    %17 = arith.addf %14, %16 : vector<16x32xf32>
    %18 = vector.shape_cast %17 : vector<16x32xf32> to vector<2x8x32xf32>
    %c0_15 = arith.constant 0 : index
    %c0_16 = arith.constant 0 : index
    %19 = vector.load %arg5[%c0_15, %c0_16] : memref<32x32xf32, #tpu.memory_space<vmem>>, vector<32x32xf32>
    %cst_17 = arith.constant dense<0.000000e+00> : vector<16x32xf32>
    %20 = tpu.matmul %0, %19, %cst_17 {dimension_numbers = #tpu.dot_dimension_numbers<[1], [0], [0], [1], [0, 0, 1, 1], [], []>} : vector<16x32xf32>, vector<32x32xf32>, vector<16x32xf32> -> vector<16x32xf32>
    %c0_18 = arith.constant 0 : index
    %c0_19 = arith.constant 0 : index
    %21 = vector.load %arg10[%c0_18, %c0_19] : memref<1x32xf32, #tpu.memory_space<vmem>>, vector<1x32xf32>
    %22 = vector.broadcast %21 : vector<1x32xf32> to vector<16x32xf32>
    %23 = arith.addf %20, %22 : vector<16x32xf32>
    %24 = vector.shape_cast %23 : vector<16x32xf32> to vector<2x8x32xf32>
    %c0_20 = arith.constant 0 : index
    %c0_21 = arith.constant 0 : index
    %25 = vector.load %arg6[%c0_20, %c0_21] : memref<32x128xf32, #tpu.memory_space<vmem>>, vector<32x128xf32>
    %cst_22 = arith.constant dense<0.000000e+00> : vector<16x128xf32>
    %26 = tpu.matmul %0, %25, %cst_22 {dimension_numbers = #tpu.dot_dimension_numbers<[1], [0], [0], [1], [0, 0, 1, 1], [], []>} : vector<16x32xf32>, vector<32x128xf32>, vector<16x128xf32> -> vector<16x128xf32>
    %c0_23 = arith.constant 0 : index
    %c0_24 = arith.constant 0 : index
    %27 = vector.load %arg11[%c0_23, %c0_24] : memref<1x128xf32, #tpu.memory_space<vmem>>, vector<1x128xf32>
    %28 = vector.broadcast %27 : vector<1x128xf32> to vector<16x128xf32>
    %29 = arith.addf %26, %28 : vector<16x128xf32>
    %30 = vector.shape_cast %29 : vector<16x128xf32> to vector<2x8x128xf32>
    %cst_25 = arith.constant dense<0.000000e+00> : vector<2x8x8xf32>
    %31 = tpu.matmul %6, %18, %cst_25 {dimension_numbers = #tpu.dot_dimension_numbers<[2], [2], [1], [1], [0, 0, 0, 1, 1, 1], [0], [0]>} : vector<2x8x32xf32>, vector<2x8x32xf32>, vector<2x8x8xf32> -> vector<2x8x8xf32>
    %cst_26 = arith.constant dense<0.000000e+00> : vector<2x8x8xf32>
    %32 = tpu.matmul %12, %24, %cst_26 {dimension_numbers = #tpu.dot_dimension_numbers<[2], [2], [1], [1], [0, 0, 0, 1, 1, 1], [0], [0]>} : vector<2x8x32xf32>, vector<2x8x32xf32>, vector<2x8x8xf32> -> vector<2x8x8xf32>
    %cst_27 = arith.constant dense<0xFF800000> : vector<2x8xf32>
    %33 = vector.multi_reduction <maximumf>, %31, %cst_27 [2] : vector<2x8x8xf32> to vector<2x8xf32>
    %34 = vector.shape_cast %33 : vector<2x8xf32> to vector<2x8x1xf32>
    %35 = vector.broadcast %34 : vector<2x8x1xf32> to vector<2x8x8xf32>
    %36 = arith.subf %31, %35 : vector<2x8x8xf32>
    %37 = math.exp %36 : vector<2x8x8xf32>
    %cst_28 = arith.constant dense<0.000000e+00> : vector<2x8xf32>
    %38 = vector.multi_reduction <add>, %37, %cst_28 [2] : vector<2x8x8xf32> to vector<2x8xf32>
    %39 = vector.shape_cast %38 : vector<2x8xf32> to vector<2x8x1xf32>
    %40 = tpu.reciprocal %39 {approx = true} : vector<2x8x1xf32> -> vector<2x8x1xf32>
    %41 = vector.broadcast %40 : vector<2x8x1xf32> to vector<2x8x8xf32>
    %42 = arith.mulf %37, %41 : vector<2x8x8xf32>
    %cst_29 = arith.constant dense<0xFF800000> : vector<2x8xf32>
    %43 = vector.multi_reduction <maximumf>, %32, %cst_29 [2] : vector<2x8x8xf32> to vector<2x8xf32>
    %44 = vector.shape_cast %43 : vector<2x8xf32> to vector<2x8x1xf32>
    %45 = vector.broadcast %44 : vector<2x8x1xf32> to vector<2x8x8xf32>
    %46 = arith.subf %32, %45 : vector<2x8x8xf32>
    %47 = math.exp %46 : vector<2x8x8xf32>
    %cst_30 = arith.constant dense<0.000000e+00> : vector<2x8xf32>
    %48 = vector.multi_reduction <add>, %47, %cst_30 [2] : vector<2x8x8xf32> to vector<2x8xf32>
    %49 = vector.shape_cast %48 : vector<2x8xf32> to vector<2x8x1xf32>
    %50 = tpu.reciprocal %49 {approx = true} : vector<2x8x1xf32> -> vector<2x8x1xf32>
    %51 = vector.broadcast %50 : vector<2x8x1xf32> to vector<2x8x8xf32>
    %52 = arith.mulf %47, %51 : vector<2x8x8xf32>
    %c0_31 = arith.constant 0 : index
    %c0_32 = arith.constant 0 : index
    %53 = vector.load %arg12[%c0_31, %c0_32] : memref<1x8xf32, #tpu.memory_space<vmem>>, vector<1x8xf32>
    %54 = vector.shape_cast %53 : vector<1x8xf32> to vector<1x1x8xf32>
    %55 = vector.broadcast %54 : vector<1x1x8xf32> to vector<2x8x8xf32>
    %56 = arith.mulf %55, %52 : vector<2x8x8xf32>
    %57 = arith.subf %42, %56 : vector<2x8x8xf32>
    %cst_33 = arith.constant dense<0.000000e+00> : vector<2x8x128xf32>
    %58 = tpu.matmul %57, %30, %cst_33 {dimension_numbers = #tpu.dot_dimension_numbers<[2], [1], [1], [2], [0, 0, 0, 1, 1, 2], [0], [0]>} : vector<2x8x8xf32>, vector<2x8x128xf32>, vector<2x8x128xf32> -> vector<2x8x128xf32>
    %59 = vector.shape_cast %58 : vector<2x8x128xf32> to vector<16x128xf32>
    %c0_34 = arith.constant 0 : index
    %c0_35 = arith.constant 0 : index
    %60 = vector.load %arg13[%c0_34, %c0_35] : memref<16x128xf32, #tpu.memory_space<vmem>>, vector<16x128xf32>
    tpu.vector_store %arg13[%c0_34, %c0_35], %59 {strides = array<i32>} : memref<16x128xf32, #tpu.memory_space<vmem>>, vector<16x128xf32>,
    return
  }
  func.func @transform_0(%arg0: i32) -> (i32, i32) {
    %c0_i32 = arith.constant 0 : i32
    %c0_i32_0 = arith.constant 0 : i32
    return %arg0, %c0_i32 : i32, i32
  }
  func.func @transform_1(%arg0: i32) -> (i32, i32) {
    %c0_i32 = arith.constant 0 : i32
    %c0_i32_0 = arith.constant 0 : i32
    %c0_i32_1 = arith.constant 0 : i32
    return %c0_i32, %c0_i32_0 : i32, i32
  }
  func.func @transform_2(%arg0: i32) -> (i32, i32) {
    %c0_i32 = arith.constant 0 : i32
    %c0_i32_0 = arith.constant 0 : i32
    %c0_i32_1 = arith.constant 0 : i32
    return %c0_i32, %c0_i32_0 : i32, i32
  }
  func.func @transform_3(%arg0: i32) -> (i32, i32) {
    %c0_i32 = arith.constant 0 : i32
    %c0_i32_0 = arith.constant 0 : i32
    %c0_i32_1 = arith.constant 0 : i32
    return %c0_i32, %c0_i32_0 : i32, i32
  }
  func.func @transform_4(%arg0: i32) -> (i32, i32) {
    %c0_i32 = arith.constant 0 : i32
    %c0_i32_0 = arith.constant 0 : i32
    %c0_i32_1 = arith.constant 0 : i32
    return %c0_i32, %c0_i32_0 : i32, i32
  }
  func.func @transform_5(%arg0: i32) -> (i32, i32) {
    %c0_i32 = arith.constant 0 : i32
    %c0_i32_0 = arith.constant 0 : i32
    %c0_i32_1 = arith.constant 0 : i32
    return %c0_i32, %c0_i32_0 : i32, i32
  }
  func.func @transform_6(%arg0: i32) -> (i32, i32) {
    %c0_i32 = arith.constant 0 : i32
    %c0_i32_0 = arith.constant 0 : i32
    %c0_i32_1 = arith.constant 0 : i32
    return %c0_i32, %c0_i32_0 : i32, i32
  }
  func.func @transform_7(%arg0: i32) -> (i32, i32) {
    %c0_i32 = arith.constant 0 : i32
    %c0_i32_0 = arith.constant 0 : i32
    %c0_i32_1 = arith.constant 0 : i32
    return %c0_i32, %c0_i32_0 : i32, i32
  }
  func.func @transform_8(%arg0: i32) -> (i32, i32) {
    %c0_i32 = arith.constant 0 : i32
    %c0_i32_0 = arith.constant 0 : i32
    %c0_i32_1 = arith.constant 0 : i32
    return %c0_i32, %c0_i32_0 : i32, i32
  }
  func.func @transform_9(%arg0: i32) -> (i32, i32) {
    %c0_i32 = arith.constant 0 : i32
    %c0_i32_0 = arith.constant 0 : i32
    %c0_i32_1 = arith.constant 0 : i32
    return %c0_i32, %c0_i32_0 : i32, i32
  }
  func.func @transform_10(%arg0: i32) -> (i32, i32) {
    %c0_i32 = arith.constant 0 : i32
    %c0_i32_0 = arith.constant 0 : i32
    %c0_i32_1 = arith.constant 0 : i32
    return %c0_i32, %c0_i32_0 : i32, i32
  }
  func.func @transform_11(%arg0: i32) -> (i32, i32) {
    %c0_i32 = arith.constant 0 : i32
    %c0_i32_0 = arith.constant 0 : i32
    %c0_i32_1 = arith.constant 0 : i32
    return %c0_i32, %c0_i32_0 : i32, i32
  }
  func.func @transform_12(%arg0: i32) -> (i32, i32) {
    %c0_i32 = arith.constant 0 : i32
    %c0_i32_0 = arith.constant 0 : i32
    return %arg0, %c0_i32 : i32, i32
  }
}

</mosaic_0001>

<bundles_post_ra>
// kernel: tpu_custom_call.1
= control target key start
LH: loop header
LB: loop body
LE: loop exit
PB: predicated region body
PF: predicated region fallthrough
CT: control target
= control target key end

     0   :  { %17 = vsyncpa [#allocation3], 0  ;;  %s925_s0 = inlined_call_operand.hbm [shape: f32[16,32], index: 0, kind: input, shape index: {}]   ;;  %s926_s1 = inlined_call_operand.hbm [shape: f32[32,32], index: 1, kind: input, shape index: {}]   ;;  %s927_s2 = inlined_call_operand.hbm [shape: f32[32,32], index: 2, kind: input, shape index: {}]   ;;  %s928_s3 = inlined_call_operand.hbm [shape: f32[32,32], index: 3, kind: input, shape index: {}]   ;;  %s929_s4 = inlined_call_operand.hbm [shape: f32[32,32], index: 4, kind: input, shape index: {}]   ;;  %s930_s5 = inlined_call_operand.hbm [shape: f32[32,128], index: 5, kind: input, shape index: {}]   ;;  %s931_s6 = inlined_call_operand.vmem [shape: f32[1,32], index: 6, kind: input, shape index: {}]   ;;  %s932_s7 = inlined_call_operand.vmem [shape: f32[1,32], index: 7, kind: input, shape index: {}]   ;;  %s933_s8 = inlined_call_operand.vmem [shape: f32[1,32], index: 8, kind: input, shape index: {}]   ;;  %s934_s9 = inlined_call_operand.vmem [shape: f32[1,32], index: 9, kind: input, shape index: {}]   ;;  %s935_s10 = inlined_call_operand.vmem [shape: f32[1,128], index: 10, kind: input, shape index: {}]   ;;  %s936_s11 = inlined_call_operand.vmem [shape: f32[1,8], index: 11, kind: input, shape index: {}]   ;;  %s937_s12 = inlined_call_operand.hbm [shape: f32[16,128], index: 12, kind: output, shape index: {}]  }
   0x1   :  { %18 = vsyncpa [#allocation6], 0 }
   0x2   :  { %19 = vsyncpa [#allocation9], 0 }
   0x3   :  { %20 = vsyncpa [#allocation12], 0 }
   0x4   :  { %21 = vsyncpa [#allocation4], 0  ;;  %s39_s23 = sshll.u32 %s926_s1, 4  ;;  %s756_s24 = smov [#allocation5]   ;;  %s40_s23 = int_to_ptr.hbm [resolvable:$true] %s39_s23 }
   0x5   :  { %s41_s25 = sshll.u32 %s756_s24, 4  ;;  %s65_s28 = sshll.u32 %s928_s3, 4  ;;  %s42_s25 = int_to_ptr.vmem [resolvable:$true] %s41_s25  ;;  %s66_s28 = int_to_ptr.hbm [resolvable:$true] %s65_s28 }
   0x6   :  { %s757_s29 = smov 128   ;;  %s758_s30 = smov 8  }
   0x7   :  { %47 = dma.hbm_to_vmem [thread:$0]  %s40_s23, 512, %s42_s25, [#allocation6], %s757_s29, %s757_s29, %s758_s30  }
   0x8   :  { %s759_s13 = smov [#allocation8]   ;;  %s26_s1 = sshll.u32 %s925_s0, 4  ;;  %s27_s1 = int_to_ptr.hbm [resolvable:$true] %s26_s1 }
   0x9   :  { %s67_s14 = sshll.u32 %s759_s13, 4  ;;  %s52_s18 = sshll.u32 %s927_s2, 4  ;;  %s68_s14 = int_to_ptr.vmem [resolvable:$true] %s67_s14  ;;  %s53_s18 = int_to_ptr.hbm [resolvable:$true] %s52_s18 }
   0xa   :  { %73 = dma.hbm_to_vmem [thread:$0]  %s66_s28, 512, %s68_s14, [#allocation9], %s757_s29, %s757_s29, %s758_s30  }
   0xb   :  { %s760_s19 = smov [#allocation2]   ;;  %s761_s21 = smov [#allocation7]  }
   0xc   :  { %s28_s20 = sshll.u32 %s760_s19, 4  ;;  %s54_s0 = sshll.u32 %s761_s21, 4  ;;  %s29_s20 = int_to_ptr.vmem [resolvable:$true] %s28_s20  ;;  %s55_s0 = int_to_ptr.vmem [resolvable:$true] %s54_s0 }
   0xd   :  { %34 = dma.hbm_to_vmem [thread:$0]  %s27_s1, 256, %s29_s20, [#allocation3], %s757_s29, %s757_s29, %s758_s30  }
   0xe   :  { %s78_s24 = sshll.u32 %s929_s4, 4  ;;  %s91_s26 = sshll.u32 %s930_s5, 4  ;;  %s79_s24 = int_to_ptr.hbm [resolvable:$true] %s78_s24  ;;  %s92_s26 = int_to_ptr.hbm [resolvable:$true] %s91_s26 }
   0xf   :  { %60 = dma.hbm_to_vmem [thread:$0]  %s53_s18, 512, %s55_s0, [#allocation6], %s757_s29, %s757_s29, %s758_s30  }
  0x10   :  { %s762_s27 = smov [#allocation10]   ;;  %s763_s13 = smov [#allocation11]  }
  0x11   :  { %s80_s28 = sshll.u32 %s762_s27, 4  ;;  %s93_s4 = sshll.u32 %s763_s13, 4  ;;  %s81_s28 = int_to_ptr.vmem [resolvable:$true] %s80_s28  ;;  %s94_s4 = int_to_ptr.vmem [resolvable:$true] %s93_s4 }
  0x12   :  { %86 = dma.hbm_to_vmem [thread:$0]  %s79_s24, 512, %s81_s28, [#allocation9], %s757_s29, %s757_s29, %s758_s30  }
  0x13   :  { %99 = dma.hbm_to_vmem [thread:$0]  %s92_s26, 512, %s94_s4, [#allocation12], %s757_s29, %s757_s29, %s758_s30  }
  0x14   :  { %746 = dma.done.wait [#allocation3], 256  }
  0x15   :  { %747 = vsyncadd [#allocation3], 4294967040 }
  0x16   :  { %748 = dma.done.wait [#allocation6], 1024  }
  0x17   :  { %749 = vsyncadd [#allocation6], 4294966272 }
  0x18   :  { %750 = dma.done.wait [#allocation9], 1024  }
  0x19   :  { %751 = vsyncadd [#allocation9], 4294966272 }
  0x1a   :  { %752 = dma.done.wait [#allocation12], 512  }
  0x1b   :  { %753 = vsyncadd [#allocation12], 4294966784  ;;  %v210_v0 = vld [vmem:[#allocation8 + $0x18] sm:$0xff]  ;;  %v209_v2 = vld [vmem:[#allocation8 + $0x10] sm:$0xff]  ;;  %vm146_vm0 = vcmask 261120   ;;  %vm404_vm1 = vcmask 64512  }
  0x1c   :  { %v241_v1 = vld [vmem:[#allocation10 + $0x18] sm:$0xff]  ;;  %227 = vmatpush.msra.mxu2 %v210_v0  ;;  %v240_v3 = vld [vmem:[#allocation10 + $0x10] sm:$0xff]  ;;  %v208_v4 = vld [vmem:[#allocation8 + $0x8] sm:$0xff]  ;;  %s511_s21 = sshll.u32 %s937_s12, 4  ;;  %s512_s21 = int_to_ptr.hbm [resolvable:$true] %s511_s21 }
  0x1d   :  { %258 = vmatpush.msra.mxu3 %v241_v1  ;;  %v239_v5 = vld [vmem:[#allocation10 + $0x8] sm:$0xff]  ;;  %v141_v6 = vld [vmem:[#allocation5 + $0x18] sm:$0xff]  ;;  %v140_v8 = vld [vmem:[#allocation5 + $0x10] sm:$0xff] }
  0x1e   :  { %228 = vmatpush.msra.mxu2 %v209_v2  ;;  %v179_v7 = vld [vmem:[#allocation7 + $0x18] sm:$0xff]  ;;  %v207_v9 = vld [vmem:[#allocation8] sm:$0xff]  ;;  %165 = vmatpush.msra.mxu0 %v141_v6  ;;  %v178_v11 = vld [vmem:[#allocation7 + $0x10] sm:$0xff] }
  0x1f   :  { %259 = vmatpush.msra.mxu3 %v240_v3  ;;  %v238_v10 = vld [vmem:[#allocation10] sm:$0xff]  ;;  %196 = vmatpush.msra.mxu1 %v179_v7  ;;  %v866_v12 = vld [vmem:[#allocation2] sm:$0xff]  ;;  %v139_v13 = vld [vmem:[#allocation5 + $0x8] sm:$0xff] }
  0x20   :  { %229 = vmatpush.msra.mxu2 %v208_v4  ;;  %166 = vmatpush.msra.mxu0 %v140_v8  ;;  %v177_v14 = vld [vmem:[#allocation7 + $0x8] sm:$0xff]  ;;  %v138_v15 = vld [vmem:[#allocation5] sm:$0xff]  ;;  %v137_v17 = vld [vmem:[#allocation2 + $0x8] sm:$0xff] }
  0x21   :  { %260 = vmatpush.msra.mxu3 %v239_v5  ;;  %197 = vmatpush.msra.mxu1 %v178_v11  ;;  %v176_v16 = vld [vmem:[#allocation7] sm:$0xff]  ;;  %v556_v18 = vld [vmem:[%s933_s8] ss:$0 sm:$0xff]  ;;  %v272_v46 = vld [vmem:[#allocation11 + $0x18] sm:$0xff] }
  0x22   :  { %230 = vmatpush.msra.mxu2 %v207_v9  ;;  %167 = vmatpush.msra.mxu0 %v139_v13  ;;  %v557_v19 = vld [vmem:[%s934_s9] ss:$0 sm:$0xff]  ;;  %v270_v48 = vld [vmem:[#allocation11 + $0x8] sm:$0xff]  ;;  %v269_v49 = vld [vmem:[#allocation11] sm:$0xff] }
  0x23   :  { %261 = vmatpush.msra.mxu3 %v238_v10  ;;  %531 = vmatmul.msk.f32.vlgmr.msra.gmra.mxu2 %vm146_vm0, %v866_v12  ;;  %v558_v20 = vld [vmem:[%s931_s6] ss:$0 sm:$0xff] }
  0x24   :  { %533 = vmatmul.msk.f32.vlgmr.msra.gmra.mxu3 %vm146_vm0, %v866_v12  ;;  %198 = vmatpush.msra.mxu1 %v177_v14  ;;  %v559_v22 = vld [vmem:[%s932_s7] ss:$0 sm:$0xff] }
  0x25   :  { %168 = vmatpush.msra.mxu0 %v138_v15  ;;  %v271_v47 = vld [vmem:[#allocation11 + $0x10] sm:$0xff] }
  0x26   :  { %199 = vmatpush.msra.mxu1 %v176_v16  ;;  %527 = vmatmul.msk.f32.vlgmr.msra.gmra.mxu0 %vm146_vm0, %v866_v12  ;;  %v561_v6 = vld [vmem:[%s935_s10] ss:$0 sm:$0xff]  ;;  %s764_s10 = smov [#allocation13]  }
  0x27   :  { %529 = vmatmul.msk.f32.vlgmr.msra.gmra.mxu1 %vm146_vm0, %v866_v12  ;;  %289 = vmatpush.msrb.mxu0 %v272_v46  ;;  %v560_v14 = vld [vmem:[%s936_s11] ss:$0 sm:$0xff]  ;;  %s509_s11 = sshll.u32 %s764_s10, 4  ;;  %s510_s11 = int_to_ptr.vmem [resolvable:$true] %s509_s11 }
  0x29   :  { %290 = vmatpush.msrb.mxu0 %v271_v47 }
  0x2b   :  { %532 = vmatmul.msk.f32.gmra.mxu2 %vm146_vm0, %v137_v17  ;;  %291 = vmatpush.msrb.mxu0 %v270_v48 }
  0x2c   :  { %534 = vmatmul.msk.f32.gmra.mxu3 %vm146_vm0, %v137_v17 }
  0x2d   :  { %292 = vmatpush.msrb.mxu0 %v269_v49 }
  0x2e   :  { %528 = vmatmul.msk.f32.gmra.mxu0 %vm146_vm0, %v137_v17 }
  0x2f   :  { %530 = vmatmul.msk.f32.gmra.mxu1 %vm146_vm0, %v137_v17 }
  0x36   :  { %535 = vmatmul.msk.f32.vlgmr.msrb.gmra.mxu0 %vm146_vm0, %v866_v12 }
  0x3e   :  { %536 = vmatmul.msk.f32.gmra.mxu0 %vm146_vm0, %v137_v17 }
  0xa3   :  { %v170_v21 = vpop.f32.mrf.mxu0 }
  0xa4   :  { %v201_v23 = vpop.f32.mrf.mxu1  ;;  %v171_v28 = vadd.f32 %v558_v20, %v170_v21 }
  0xa5   :  { %v202_v29 = vadd.f32 %v559_v22, %v201_v23 }
  0xa6   :  { %v232_v24 = vpop.f32.mrf.mxu2 }
  0xa7   :  { %v263_v25 = vpop.f32.mrf.mxu3  ;;  %v233_v26 = vadd.f32 %v556_v18, %v232_v24 }
  0xa8   :  { %v264_v27 = vadd.f32 %v557_v19, %v263_v25 }
  0xa9   :  { %537 = vmatpush.xpose.msk.msrb.mxu1 %vm146_vm0, %v233_v26 }
  0xaa   :  { %541 = vmatpush.xpose.msk.msrb.mxu3 %vm146_vm0, %v264_v27 }
  0xab   :  { %v173_v30 = vpop.f32.mrf.mxu0 }
  0xac   :  { %538 = vmatmul.msk.f32.vlgmr.msrb.gmra.mxu1 %vm146_vm0, %v171_v28  ;;  %v204_v31 = vpop.f32.mrf.mxu1  ;;  %v174_v36 = vadd.f32 %v558_v20, %v173_v30 }
  0xad   :  { %542 = vmatmul.msk.f32.vlgmr.msrb.gmra.mxu3 %vm146_vm0, %v202_v29  ;;  %v205_v37 = vadd.f32 %v559_v22, %v204_v31 }
  0xae   :  { %v235_v32 = vpop.f32.mrf.mxu2 }
  0xaf   :  { %v266_v33 = vpop.f32.mrf.mxu3  ;;  %v236_v34 = vadd.f32 %v556_v18, %v235_v32 }
  0xb0   :  { %v267_v35 = vadd.f32 %v557_v19, %v266_v33 }
  0xb1   :  { %539 = vmatpush.xpose.msk.msrb.mxu2 %vm146_vm0, %v236_v34 }
  0xb2   :  { %543 = vmatpush.xpose.msk.msra.mxu1 %vm146_vm0, %v267_v35 }
  0xb3   :  { %v294_v7 = vpop.f32.mrf.mxu0 }
  0xb4   :  { %540 = vmatmul.msk.f32.vlgmr.msrb.gmra.mxu2 %vm146_vm0, %v174_v36  ;;  %v295_v8 = vadd.f32 %v561_v6, %v294_v7 }
  0xb5   :  { %544 = vmatmul.msk.f32.vlgmr.msra.gmra.mxu1 %vm146_vm0, %v205_v37 }
  0xb6   :  { %475 = vmatpush.msra.mxu2 %v295_v8 }
  0xbb   :  { %v297_v9 = vpop.f32.mrf.mxu0 }
  0xbc   :  { %v298_v10 = vadd.f32 %v561_v6, %v297_v9 }
  0xbe   :  { %498 = vmatpush.msra.mxu3 %v298_v10 }
 0x129   :  { %v323_v38 = vpop.f32.mrf.mxu1 }
 0x12a   :  { %v405_v39 = vsel %vm404_vm1, %v323_v38, -inf }
 0x12b   :  { %406 = vmax.xlane.f32.xlu1 %v405_v39 }
 0x130   :  { %v375_v40 = vpop.f32.mrf.mxu3 }
 0x131   :  { %v427_v41 = vsel %vm404_vm1, %v375_v40, -inf }
 0x132   :  { %428 = vmax.xlane.f32.xlu0 %v427_v41  ;;  %v401_v42 = vpop.f32.mrf.mxu1 }
 0x133   :  { %v430_v43 = vsel %vm404_vm1, %v401_v42, -inf }
 0x137   :  { %v349_v44 = vpop.f32.mrf.mxu2 }
 0x138   :  { %v408_v45 = vsel %vm404_vm1, %v349_v44, -inf }
 0x139   :  { %409 = vmax.xlane.f32.xlu1 %v408_v45 }
 0x13a   :  { %431 = vmax.xlane.f32.xlu0 %v430_v43 }
 0x19e   :  { %v407_v50 = vpop.xlane.xlu1 %406 }
 0x19f   :  { %v411_v51 = vsub.f32 %v323_v38, %v407_v50 }
 0x1a1   :  { %v413_v52 = vmul.f32 1.442695, %v411_v51 }
 0x1a3   :  { %562 = vpow2.f32 %v413_v52 }
 0x1a5   :  { %v429_v53 = vpop.xlane.xlu0 %428 }
 0x1a6   :  { %v433_v54 = vsub.f32 %v375_v40, %v429_v53 }
 0x1a8   :  { %v435_v55 = vmul.f32 1.442695, %v433_v54 }
 0x1a9   :  { %v563_v56 = vpop.eup %562 }
 0x1aa   :  { %564 = vpow2.f32 %v435_v55  ;;  %v417_v57 = vsel %vm404_vm1, %v563_v56, 0.0 }
 0x1ab   :  { %418 = vadd.xlane.f32.xlu0 %v417_v57 }
 0x1ac   :  { %v410_v58 = vpop.xlane.xlu1 %409 }
 0x1ad   :  { %v432_v59 = vpop.xlane.xlu0 %431  ;;  %v412_v60 = vsub.f32 %v349_v44, %v410_v58 }
 0x1ae   :  { %v434_v61 = vsub.f32 %v401_v42, %v432_v59 }
 0x1af   :  { %v415_v63 = vmul.f32 1.442695, %v412_v60 }
 0x1b0   :  { %v565_v62 = vpop.eup %564  ;;  %v437_v0 = vmul.f32 1.442695, %v434_v61 }
 0x1b1   :  { %v439_v1 = vsel %vm404_vm1, %v565_v62, 0.0  ;;  %566 = vpow2.f32 %v415_v63 }
 0x1b2   :  { %440 = vadd.xlane.f32.xlu2 %v439_v1  ;;  %568 = vpow2.f32 %v437_v0 }
 0x1b7   :  { %v567_v2 = vpop.eup %566 }
 0x1b8   :  { %v569_v3 = vpop.eup %568  ;;  %v420_v4 = vsel %vm404_vm1, %v567_v2, 0.0 }
 0x1b9   :  { %421 = vadd.xlane.f32.xlu1 %v420_v4  ;;  %v442_v5 = vsel %vm404_vm1, %v569_v3, 0.0 }
 0x1ba   :  { %443 = vadd.xlane.f32.xlu2 %v442_v5 }
 0x21e   :  { %v419_v11 = vpop.xlane.xlu0 %418 }
 0x21f   :  { %570 = vrcp.f32 %v419_v11 }
 0x225   :  { %v441_v12 = vpop.xlane.xlu2 %440  ;;  %v571_v13 = vpop.eup %570 }
 0x226   :  { %572 = vrcp.f32 %v441_v12  ;;  %v425_v19 = vmul.f32 %v571_v13, %v563_v56 }
 0x22c   :  { %v573_v15 = vpop.eup %572  ;;  %v422_v17 = vpop.xlane.xlu1 %421 }
 0x22d   :  { %v447_v16 = vmul.f32 %v573_v15, %v565_v62  ;;  %574 = vrcp.f32 %v422_v17  ;;  %v444_v18 = vpop.xlane.xlu2 %443 }
 0x22e   :  { %576 = vrcp.f32 %v444_v18 }
 0x22f   :  { %v453_v20 = vmul.f32 %v560_v14, %v447_v16 }
 0x231   :  { %v455_v21 = vsub.f32 %v425_v19, %v453_v20 }
 0x233   :  { %545 = vmatmul.msk.f32.vlgmr.msra.gmra.mxu2 %vm404_vm1, %v455_v21  ;;  %v575_v22 = vpop.eup %574 }
 0x234   :  { %v577_v23 = vpop.eup %576  ;;  %v426_v25 = vmul.f32 %v575_v22, %v567_v2 }
 0x235   :  { %v448_v24 = vmul.f32 %v577_v23, %v569_v3 }
 0x237   :  { %v454_v26 = vmul.f32 %v560_v14, %v448_v24 }
 0x239   :  { %v456_v27 = vsub.f32 %v426_v25, %v454_v26 }
 0x23b   :  { %546 = vmatmul.msk.f32.vlgmr.msra.gmra.mxu3 %vm404_vm1, %v456_v27 }
 0x2b6   :  { %v477_v28 = vpop.f32.mrf.mxu2 }
 0x2b7   :  { %503 = vst [vmem:[#allocation13] sm:$0xff] %v477_v28 }
 0x2be   :  { %v500_v29 = vpop.f32.mrf.mxu3 }
 0x2bf   :  { %504 = vst [vmem:[#allocation13 + $0x8] sm:$0xff] %v500_v29 }
 0x2c0   :  { %517 = dma.vmem_to_hbm [thread:$0]  %s510_s11, 256, %s512_s21, [#allocation4], %s757_s29, %s757_s29, %s758_s30  }
 0x2c1   :  { %754 = dma.done.wait [#allocation4], 256  }
 0x2c2   :  { %755 = vsyncadd [#allocation4], 4294967040 }
 0x2c3   :  { %522 = vsyncpa [#allocation3], 1 }
 0x2c4   :  { %523 = vsyncpa [#allocation6], 1 }
 0x2c5   :  { %524 = vsyncpa [#allocation9], 1 }
 0x2c6   :  { %525 = vsyncpa [#allocation12], 1 }
 0x2c7   :  { %526 = vsyncpa [#allocation4], 1 }

// kernel: tpu_custom_call.1
= control target key start
LH: loop header
LB: loop body
LE: loop exit
PB: predicated region body
PF: predicated region fallthrough
CT: control target
= control target key end

     0   :  { %17 = vsyncpa [#allocation3], 0  ;;  %s925_s0 = inlined_call_operand.hbm [shape: f32[16,32], index: 0, kind: input, shape index: {}]   ;;  %s926_s1 = inlined_call_operand.hbm [shape: f32[32,32], index: 1, kind: input, shape index: {}]   ;;  %s927_s2 = inlined_call_operand.hbm [shape: f32[32,32], index: 2, kind: input, shape index: {}]   ;;  %s928_s3 = inlined_call_operand.hbm [shape: f32[32,32], index: 3, kind: input, shape index: {}]   ;;  %s929_s4 = inlined_call_operand.hbm [shape: f32[32,32], index: 4, kind: input, shape index: {}]   ;;  %s930_s5 = inlined_call_operand.hbm [shape: f32[32,128], index: 5, kind: input, shape index: {}]   ;;  %s931_s6 = inlined_call_operand.vmem [shape: f32[1,32], index: 6, kind: input, shape index: {}]   ;;  %s932_s7 = inlined_call_operand.vmem [shape: f32[1,32], index: 7, kind: input, shape index: {}]   ;;  %s933_s8 = inlined_call_operand.vmem [shape: f32[1,32], index: 8, kind: input, shape index: {}]   ;;  %s934_s9 = inlined_call_operand.vmem [shape: f32[1,32], index: 9, kind: input, shape index: {}]   ;;  %s935_s10 = inlined_call_operand.vmem [shape: f32[1,128], index: 10, kind: input, shape index: {}]   ;;  %s936_s11 = inlined_call_operand.vmem [shape: f32[1,8], index: 11, kind: input, shape index: {}]   ;;  %s937_s12 = inlined_call_operand.hbm [shape: f32[16,128], index: 12, kind: output, shape index: {}]  }
   0x1   :  { %18 = vsyncpa [#allocation6], 0 }
   0x2   :  { %19 = vsyncpa [#allocation9], 0 }
   0x3   :  { %20 = vsyncpa [#allocation12], 0 }
   0x4   :  { %21 = vsyncpa [#allocation4], 0  ;;  %s39_s23 = sshll.u32 %s926_s1, 4  ;;  %s756_s24 = smov [#allocation5]   ;;  %s40_s23 = int_to_ptr.hbm [resolvable:$true] %s39_s23 }
   0x5   :  { %s41_s25 = sshll.u32 %s756_s24, 4  ;;  %s65_s28 = sshll.u32 %s928_s3, 4  ;;  %s42_s25 = int_to_ptr.vmem [resolvable:$true] %s41_s25  ;;  %s66_s28 = int_to_ptr.hbm [resolvable:$true] %s65_s28 }
   0x6   :  { %s757_s29 = smov 128   ;;  %s758_s30 = smov 8  }
   0x7   :  { %47 = dma.hbm_to_vmem [thread:$0]  %s40_s23, 512, %s42_s25, [#allocation6], %s757_s29, %s757_s29, %s758_s30  }
   0x8   :  { %s759_s13 = smov [#allocation8]   ;;  %s26_s1 = sshll.u32 %s925_s0, 4  ;;  %s27_s1 = int_to_ptr.hbm [resolvable:$true] %s26_s1 }
   0x9   :  { %s67_s14 = sshll.u32 %s759_s13, 4  ;;  %s52_s18 = sshll.u32 %s927_s2, 4  ;;  %s68_s14 = int_to_ptr.vmem [resolvable:$true] %s67_s14  ;;  %s53_s18 = int_to_ptr.hbm [resolvable:$true] %s52_s18 }
   0xa   :  { %73 = dma.hbm_to_vmem [thread:$0]  %s66_s28, 512, %s68_s14, [#allocation9], %s757_s29, %s757_s29, %s758_s30  }
   0xb   :  { %s760_s19 = smov [#allocation2]   ;;  %s761_s21 = smov [#allocation7]  }
   0xc   :  { %s28_s20 = sshll.u32 %s760_s19, 4  ;;  %s54_s0 = sshll.u32 %s761_s21, 4  ;;  %s29_s20 = int_to_ptr.vmem [resolvable:$true] %s28_s20  ;;  %s55_s0 = int_to_ptr.vmem [resolvable:$true] %s54_s0 }
   0xd   :  { %34 = dma.hbm_to_vmem [thread:$0]  %s27_s1, 256, %s29_s20, [#allocation3], %s757_s29, %s757_s29, %s758_s30  }
   0xe   :  { %s78_s24 = sshll.u32 %s929_s4, 4  ;;  %s91_s26 = sshll.u32 %s930_s5, 4  ;;  %s79_s24 = int_to_ptr.hbm [resolvable:$true] %s78_s24  ;;  %s92_s26 = int_to_ptr.hbm [resolvable:$true] %s91_s26 }
   0xf   :  { %60 = dma.hbm_to_vmem [thread:$0]  %s53_s18, 512, %s55_s0, [#allocation6], %s757_s29, %s757_s29, %s758_s30  }
  0x10   :  { %s762_s27 = smov [#allocation10]   ;;  %s763_s13 = smov [#allocation11]  }
  0x11   :  { %s80_s28 = sshll.u32 %s762_s27, 4  ;;  %s93_s4 = sshll.u32 %s763_s13, 4  ;;  %s81_s28 = int_to_ptr.vmem [resolvable:$true] %s80_s28  ;;  %s94_s4 = int_to_ptr.vmem [resolvable:$true] %s93_s4 }
  0x12   :  { %86 = dma.hbm_to_vmem [thread:$0]  %s79_s24, 512, %s81_s28, [#allocation9], %s757_s29, %s757_s29, %s758_s30  }
  0x13   :  { %99 = dma.hbm_to_vmem [thread:$0]  %s92_s26, 512, %s94_s4, [#allocation12], %s757_s29, %s757_s29, %s758_s30  }
  0x14   :  { %746 = dma.done.wait [#allocation3], 256  }
  0x15   :  { %747 = vsyncadd [#allocation3], 4294967040 }
  0x16   :  { %748 = dma.done.wait [#allocation6], 1024  }
  0x17   :  { %749 = vsyncadd [#allocation6], 4294966272 }
  0x18   :  { %750 = dma.done.wait [#allocation9], 1024  }
  0x19   :  { %751 = vsyncadd [#allocation9], 4294966272 }
  0x1a   :  { %752 = dma.done.wait [#allocation12], 512  }
  0x1b   :  { %753 = vsyncadd [#allocation12], 4294966784  ;;  %v210_v0 = vld [vmem:[#allocation8 + $0x18] sm:$0xff]  ;;  %v209_v2 = vld [vmem:[#allocation8 + $0x10] sm:$0xff]  ;;  %vm146_vm0 = vcmask 261120   ;;  %vm404_vm1 = vcmask 64512  }
  0x1c   :  { %v241_v1 = vld [vmem:[#allocation10 + $0x18] sm:$0xff]  ;;  %227 = vmatpush.msra.mxu2 %v210_v0  ;;  %v240_v3 = vld [vmem:[#allocation10 + $0x10] sm:$0xff]  ;;  %v208_v4 = vld [vmem:[#allocation8 + $0x8] sm:$0xff]  ;;  %s511_s21 = sshll.u32 %s937_s12, 4  ;;  %s512_s21 = int_to_ptr.hbm [resolvable:$true] %s511_s21 }
  0x1d   :  { %258 = vmatpush.msra.mxu3 %v241_v1  ;;  %v239_v5 = vld [vmem:[#allocation10 + $0x8] sm:$0xff]  ;;  %v141_v6 = vld [vmem:[#allocation5 + $0x18] sm:$0xff]  ;;  %v140_v8 = vld [vmem:[#allocation5 + $0x10] sm:$0xff] }
  0x1e   :  { %228 = vmatpush.msra.mxu2 %v209_v2  ;;  %v179_v7 = vld [vmem:[#allocation7 + $0x18] sm:$0xff]  ;;  %v207_v9 = vld [vmem:[#allocation8] sm:$0xff]  ;;  %165 = vmatpush.msra.mxu0 %v141_v6  ;;  %v178_v11 = vld [vmem:[#allocation7 + $0x10] sm:$0xff] }
  0x1f   :  { %259 = vmatpush.msra.mxu3 %v240_v3  ;;  %v238_v10 = vld [vmem:[#allocation10] sm:$0xff]  ;;  %196 = vmatpush.msra.mxu1 %v179_v7  ;;  %v866_v12 = vld [vmem:[#allocation2] sm:$0xff]  ;;  %v139_v13 = vld [vmem:[#allocation5 + $0x8] sm:$0xff] }
  0x20   :  { %229 = vmatpush.msra.mxu2 %v208_v4  ;;  %166 = vmatpush.msra.mxu0 %v140_v8  ;;  %v177_v14 = vld [vmem:[#allocation7 + $0x8] sm:$0xff]  ;;  %v138_v15 = vld [vmem:[#allocation5] sm:$0xff]  ;;  %v137_v17 = vld [vmem:[#allocation2 + $0x8] sm:$0xff] }
  0x21   :  { %260 = vmatpush.msra.mxu3 %v239_v5  ;;  %197 = vmatpush.msra.mxu1 %v178_v11  ;;  %v176_v16 = vld [vmem:[#allocation7] sm:$0xff]  ;;  %v556_v18 = vld [vmem:[%s933_s8] ss:$0 sm:$0xff]  ;;  %v272_v46 = vld [vmem:[#allocation11 + $0x18] sm:$0xff] }
  0x22   :  { %230 = vmatpush.msra.mxu2 %v207_v9  ;;  %167 = vmatpush.msra.mxu0 %v139_v13  ;;  %v557_v19 = vld [vmem:[%s934_s9] ss:$0 sm:$0xff]  ;;  %v270_v48 = vld [vmem:[#allocation11 + $0x8] sm:$0xff]  ;;  %v269_v49 = vld [vmem:[#allocation11] sm:$0xff] }
  0x23   :  { %261 = vmatpush.msra.mxu3 %v238_v10  ;;  %531 = vmatmul.msk.f32.vlgmr.msra.gmra.mxu2 %vm146_vm0, %v866_v12  ;;  %v558_v20 = vld [vmem:[%s931_s6] ss:$0 sm:$0xff] }
  0x24   :  { %533 = vmatmul.msk.f32.vlgmr.msra.gmra.mxu3 %vm146_vm0, %v866_v12  ;;  %198 = vmatpush.msra.mxu1 %v177_v14  ;;  %v559_v22 = vld [vmem:[%s932_s7] ss:$0 sm:$0xff] }
  0x25   :  { %168 = vmatpush.msra.mxu0 %v138_v15  ;;  %v271_v47 = vld [vmem:[#allocation11 + $0x10] sm:$0xff] }
  0x26   :  { %199 = vmatpush.msra.mxu1 %v176_v16  ;;  %527 = vmatmul.msk.f32.vlgmr.msra.gmra.mxu0 %vm146_vm0, %v866_v12  ;;  %v561_v6 = vld [vmem:[%s935_s10] ss:$0 sm:$0xff]  ;;  %s764_s10 = smov [#allocation13]  }
  0x27   :  { %529 = vmatmul.msk.f32.vlgmr.msra.gmra.mxu1 %vm146_vm0, %v866_v12  ;;  %289 = vmatpush.msrb.mxu0 %v272_v46  ;;  %v560_v14 = vld [vmem:[%s936_s11] ss:$0 sm:$0xff]  ;;  %s509_s11 = sshll.u32 %s764_s10, 4  ;;  %s510_s11 = int_to_ptr.vmem [resolvable:$true] %s509_s11 }
  0x29   :  { %290 = vmatpush.msrb.mxu0 %v271_v47 }
  0x2b   :  { %532 = vmatmul.msk.f32.gmra.mxu2 %vm146_vm0, %v137_v17  ;;  %291 = vmatpush.msrb.mxu0 %v270_v48 }
  0x2c   :  { %534 = vmatmul.msk.f32.gmra.mxu3 %vm146_vm0, %v137_v17 }
  0x2d   :  { %292 = vmatpush.msrb.mxu0 %v269_v49 }
  0x2e   :  { %528 = vmatmul.msk.f32.gmra.mxu0 %vm146_vm0, %v137_v17 }
  0x2f   :  { %530 = vmatmul.msk.f32.gmra.mxu1 %vm146_vm0, %v137_v17 }
  0x36   :  { %535 = vmatmul.msk.f32.vlgmr.msrb.gmra.mxu0 %vm146_vm0, %v866_v12 }
  0x3e   :  { %536 = vmatmul.msk.f32.gmra.mxu0 %vm146_vm0, %v137_v17 }
  0xa3   :  { %v170_v21 = vpop.f32.mrf.mxu0 }
  0xa4   :  { %v201_v23 = vpop.f32.mrf.mxu1  ;;  %v171_v28 = vadd.f32 %v558_v20, %v170_v21 }
  0xa5   :  { %v202_v29 = vadd.f32 %v559_v22, %v201_v23 }
  0xa6   :  { %v232_v24 = vpop.f32.mrf.mxu2 }
  0xa7   :  { %v263_v25 = vpop.f32.mrf.mxu3  ;;  %v233_v26 = vadd.f32 %v556_v18, %v232_v24 }
  0xa8   :  { %v264_v27 = vadd.f32 %v557_v19, %v263_v25 }
  0xa9   :  { %537 = vmatpush.xpose.msk.msrb.mxu1 %vm146_vm0, %v233_v26 }
  0xaa   :  { %541 = vmatpush.xpose.msk.msrb.mxu3 %vm146_vm0, %v264_v27 }
  0xab   :  { %v173_v30 = vpop.f32.mrf.mxu0 }
  0xac   :  { %538 = vmatmul.msk.f32.vlgmr.msrb.gmra.mxu1 %vm146_vm0, %v171_v28  ;;  %v204_v31 = vpop.f32.mrf.mxu1  ;;  %v174_v36 = vadd.f32 %v558_v20, %v173_v30 }
  0xad   :  { %542 = vmatmul.msk.f32.vlgmr.msrb.gmra.mxu3 %vm146_vm0, %v202_v29  ;;  %v205_v37 = vadd.f32 %v559_v22, %v204_v31 }
  0xae   :  { %v235_v32 = vpop.f32.mrf.mxu2 }
  0xaf   :  { %v266_v33 = vpop.f32.mrf.mxu3  ;;  %v236_v34 = vadd.f32 %v556_v18, %v235_v32 }
  0xb0   :  { %v267_v35 = vadd.f32 %v557_v19, %v266_v33 }
  0xb1   :  { %539 = vmatpush.xpose.msk.msrb.mxu2 %vm146_vm0, %v236_v34 }
  0xb2   :  { %543 = vmatpush.xpose.msk.msra.mxu1 %vm146_vm0, %v267_v35 }
  0xb3   :  { %v294_v7 = vpop.f32.mrf.mxu0 }
  0xb4   :  { %540 = vmatmul.msk.f32.vlgmr.msrb.gmra.mxu2 %vm146_vm0, %v174_v36  ;;  %v295_v8 = vadd.f32 %v561_v6, %v294_v7 }
  0xb5   :  { %544 = vmatmul.msk.f32.vlgmr.msra.gmra.mxu1 %vm146_vm0, %v205_v37 }
  0xb6   :  { %475 = vmatpush.msra.mxu2 %v295_v8 }
  0xbb   :  { %v297_v9 = vpop.f32.mrf.mxu0 }
  0xbc   :  { %v298_v10 = vadd.f32 %v561_v6, %v297_v9 }
  0xbe   :  { %498 = vmatpush.msra.mxu3 %v298_v10 }
 0x129   :  { %v323_v38 = vpop.f32.mrf.mxu1 }
 0x12a   :  { %v405_v39 = vsel %vm404_vm1, %v323_v38, -inf }
 0x12b   :  { %406 = vmax.xlane.f32.xlu1 %v405_v39 }
 0x130   :  { %v375_v40 = vpop.f32.mrf.mxu3 }
 0x131   :  { %v427_v41 = vsel %vm404_vm1, %v375_v40, -inf }
 0x132   :  { %428 = vmax.xlane.f32.xlu0 %v427_v41  ;;  %v401_v42 = vpop.f32.mrf.mxu1 }
 0x133   :  { %v430_v43 = vsel %vm404_vm1, %v401_v42, -inf }
 0x137   :  { %v349_v44 = vpop.f32.mrf.mxu2 }
 0x138   :  { %v408_v45 = vsel %vm404_vm1, %v349_v44, -inf }
 0x139   :  { %409 = vmax.xlane.f32.xlu1 %v408_v45 }
 0x13a   :  { %431 = vmax.xlane.f32.xlu0 %v430_v43 }
 0x19e   :  { %v407_v50 = vpop.xlane.xlu1 %406 }
 0x19f   :  { %v411_v51 = vsub.f32 %v323_v38, %v407_v50 }
 0x1a1   :  { %v413_v52 = vmul.f32 1.442695, %v411_v51 }
 0x1a3   :  { %562 = vpow2.f32 %v413_v52 }
 0x1a5   :  { %v429_v53 = vpop.xlane.xlu0 %428 }
 0x1a6   :  { %v433_v54 = vsub.f32 %v375_v40, %v429_v53 }
 0x1a8   :  { %v435_v55 = vmul.f32 1.442695, %v433_v54 }
 0x1a9   :  { %v563_v56 = vpop.eup %562 }
 0x1aa   :  { %564 = vpow2.f32 %v435_v55  ;;  %v417_v57 = vsel %vm404_vm1, %v563_v56, 0.0 }
 0x1ab   :  { %418 = vadd.xlane.f32.xlu0 %v417_v57 }
 0x1ac   :  { %v410_v58 = vpop.xlane.xlu1 %409 }
 0x1ad   :  { %v432_v59 = vpop.xlane.xlu0 %431  ;;  %v412_v60 = vsub.f32 %v349_v44, %v410_v58 }
 0x1ae   :  { %v434_v61 = vsub.f32 %v401_v42, %v432_v59 }
 0x1af   :  { %v415_v63 = vmul.f32 1.442695, %v412_v60 }
 0x1b0   :  { %v565_v62 = vpop.eup %564  ;;  %v437_v0 = vmul.f32 1.442695, %v434_v61 }
 0x1b1   :  { %v439_v1 = vsel %vm404_vm1, %v565_v62, 0.0  ;;  %566 = vpow2.f32 %v415_v63 }
 0x1b2   :  { %440 = vadd.xlane.f32.xlu2 %v439_v1  ;;  %568 = vpow2.f32 %v437_v0 }
 0x1b7   :  { %v567_v2 = vpop.eup %566 }
 0x1b8   :  { %v569_v3 = vpop.eup %568  ;;  %v420_v4 = vsel %vm404_vm1, %v567_v2, 0.0 }
 0x1b9   :  { %421 = vadd.xlane.f32.xlu1 %v420_v4  ;;  %v442_v5 = vsel %vm404_vm1, %v569_v3, 0.0 }
 0x1ba   :  { %443 = vadd.xlane.f32.xlu2 %v442_v5 }
 0x21e   :  { %v419_v11 = vpop.xlane.xlu0 %418 }
 0x21f   :  { %570 = vrcp.f32 %v419_v11 }
 0x225   :  { %v441_v12 = vpop.xlane.xlu2 %440  ;;  %v571_v13 = vpop.eup %570 }
 0x226   :  { %572 = vrcp.f32 %v441_v12  ;;  %v425_v19 = vmul.f32 %v571_v13, %v563_v56 }
 0x22c   :  { %v573_v15 = vpop.eup %572  ;;  %v422_v17 = vpop.xlane.xlu1 %421 }
 0x22d   :  { %v447_v16 = vmul.f32 %v573_v15, %v565_v62  ;;  %574 = vrcp.f32 %v422_v17  ;;  %v444_v18 = vpop.xlane.xlu2 %443 }
 0x22e   :  { %576 = vrcp.f32 %v444_v18 }
 0x22f   :  { %v453_v20 = vmul.f32 %v560_v14, %v447_v16 }
 0x231   :  { %v455_v21 = vsub.f32 %v425_v19, %v453_v20 }
 0x233   :  { %545 = vmatmul.msk.f32.vlgmr.msra.gmra.mxu2 %vm404_vm1, %v455_v21  ;;  %v575_v22 = vpop.eup %574 }
 0x234   :  { %v577_v23 = vpop.eup %576  ;;  %v426_v25 = vmul.f32 %v575_v22, %v567_v2 }
 0x235   :  { %v448_v24 = vmul.f32 %v577_v23, %v569_v3 }
 0x237   :  { %v454_v26 = vmul.f32 %v560_v14, %v448_v24 }
 0x239   :  { %v456_v27 = vsub.f32 %v426_v25, %v454_v26 }
 0x23b   :  { %546 = vmatmul.msk.f32.vlgmr.msra.gmra.mxu3 %vm404_vm1, %v456_v27 }
 0x2b6   :  { %v477_v28 = vpop.f32.mrf.mxu2 }
 0x2b7   :  { %503 = vst [vmem:[#allocation13] sm:$0xff] %v477_v28 }
 0x2be   :  { %v500_v29 = vpop.f32.mrf.mxu3 }
 0x2bf   :  { %504 = vst [vmem:[#allocation13 + $0x8] sm:$0xff] %v500_v29 }
 0x2c0   :  { %517 = dma.vmem_to_hbm [thread:$0]  %s510_s11, 256, %s512_s21, [#allocation4], %s757_s29, %s757_s29, %s758_s30  }
 0x2c1   :  { %754 = dma.done.wait [#allocation4], 256  }
 0x2c2   :  { %755 = vsyncadd [#allocation4], 4294967040 }
 0x2c3   :  { %522 = vsyncpa [#allocation3], 1 }
 0x2c4   :  { %523 = vsyncpa [#allocation6], 1 }
 0x2c5   :  { %524 = vsyncpa [#allocation9], 1 }
 0x2c6   :  { %525 = vsyncpa [#allocation12], 1 }
 0x2c7   :  { %526 = vsyncpa [#allocation4], 1 }

// kernel: tpu_custom_call.1
= control target key start
LH: loop header
LB: loop body
LE: loop exit
PB: predicated region body
PF: predicated region fallthrough
CT: control target
= control target key end

     0   :  { %17 = vsyncpa [#allocation3], 0  ;;  %s925_s0 = inlined_call_operand.hbm [shape: f32[16,32], index: 0, kind: input, shape index: {}]   ;;  %s926_s1 = inlined_call_operand.hbm [shape: f32[32,32], index: 1, kind: input, shape index: {}]   ;;  %s927_s2 = inlined_call_operand.hbm [shape: f32[32,32], index: 2, kind: input, shape index: {}]   ;;  %s928_s3 = inlined_call_operand.hbm [shape: f32[32,32], index: 3, kind: input, shape index: {}]   ;;  %s929_s4 = inlined_call_operand.hbm [shape: f32[32,32], index: 4, kind: input, shape index: {}]   ;;  %s930_s5 = inlined_call_operand.hbm [shape: f32[32,128], index: 5, kind: input, shape index: {}]   ;;  %s931_s6 = inlined_call_operand.vmem [shape: f32[1,32], index: 6, kind: input, shape index: {}]   ;;  %s932_s7 = inlined_call_operand.vmem [shape: f32[1,32], index: 7, kind: input, shape index: {}]   ;;  %s933_s8 = inlined_call_operand.vmem [shape: f32[1,32], index: 8, kind: input, shape index: {}]   ;;  %s934_s9 = inlined_call_operand.vmem [shape: f32[1,32], index: 9, kind: input, shape index: {}]   ;;  %s935_s10 = inlined_call_operand.vmem [shape: f32[1,128], index: 10, kind: input, shape index: {}]   ;;  %s936_s11 = inlined_call_operand.vmem [shape: f32[1,8], index: 11, kind: input, shape index: {}]   ;;  %s937_s12 = inlined_call_operand.hbm [shape: f32[16,128], index: 12, kind: output, shape index: {}]  }
   0x1   :  { %18 = vsyncpa [#allocation6], 0 }
   0x2   :  { %19 = vsyncpa [#allocation9], 0 }
   0x3   :  { %20 = vsyncpa [#allocation12], 0 }
   0x4   :  { %21 = vsyncpa [#allocation4], 0  ;;  %s39_s23 = sshll.u32 %s926_s1, 4  ;;  %s756_s24 = smov [#allocation5]   ;;  %s40_s23 = int_to_ptr.hbm [resolvable:$true] %s39_s23 }
   0x5   :  { %s41_s25 = sshll.u32 %s756_s24, 4  ;;  %s65_s28 = sshll.u32 %s928_s3, 4  ;;  %s42_s25 = int_to_ptr.vmem [resolvable:$true] %s41_s25  ;;  %s66_s28 = int_to_ptr.hbm [resolvable:$true] %s65_s28 }
   0x6   :  { %s757_s29 = smov 128   ;;  %s758_s30 = smov 8  }
   0x7   :  { %47 = dma.hbm_to_vmem [thread:$0]  %s40_s23, 512, %s42_s25, [#allocation6], %s757_s29, %s757_s29, %s758_s30  }
   0x8   :  { %s759_s13 = smov [#allocation8]   ;;  %s26_s1 = sshll.u32 %s925_s0, 4  ;;  %s27_s1 = int_to_ptr.hbm [resolvable:$true] %s26_s1 }
   0x9   :  { %s67_s14 = sshll.u32 %s759_s13, 4  ;;  %s52_s18 = sshll.u32 %s927_s2, 4  ;;  %s68_s14 = int_to_ptr.vmem [resolvable:$true] %s67_s14  ;;  %s53_s18 = int_to_ptr.hbm [resolvable:$true] %s52_s18 }
   0xa   :  { %73 = dma.hbm_to_vmem [thread:$0]  %s66_s28, 512, %s68_s14, [#allocation9], %s757_s29, %s757_s29, %s758_s30  }
   0xb   :  { %s760_s19 = smov [#allocation2]   ;;  %s761_s21 = smov [#allocation7]  }
   0xc   :  { %s28_s20 = sshll.u32 %s760_s19, 4  ;;  %s54_s0 = sshll.u32 %s761_s21, 4  ;;  %s29_s20 = int_to_ptr.vmem [resolvable:$true] %s28_s20  ;;  %s55_s0 = int_to_ptr.vmem [resolvable:$true] %s54_s0 }
   0xd   :  { %34 = dma.hbm_to_vmem [thread:$0]  %s27_s1, 256, %s29_s20, [#allocation3], %s757_s29, %s757_s29, %s758_s30  }
   0xe   :  { %s78_s24 = sshll.u32 %s929_s4, 4  ;;  %s91_s26 = sshll.u32 %s930_s5, 4  ;;  %s79_s24 = int_to_ptr.hbm [resolvable:$true] %s78_s24  ;;  %s92_s26 = int_to_ptr.hbm [resolvable:$true] %s91_s26 }
   0xf   :  { %60 = dma.hbm_to_vmem [thread:$0]  %s53_s18, 512, %s55_s0, [#allocation6], %s757_s29, %s757_s29, %s758_s30  }
  0x10   :  { %s762_s27 = smov [#allocation10]   ;;  %s763_s13 = smov [#allocation11]  }
  0x11   :  { %s80_s28 = sshll.u32 %s762_s27, 4  ;;  %s93_s4 = sshll.u32 %s763_s13, 4  ;;  %s81_s28 = int_to_ptr.vmem [resolvable:$true] %s80_s28  ;;  %s94_s4 = int_to_ptr.vmem [resolvable:$true] %s93_s4 }
  0x12   :  { %86 = dma.hbm_to_vmem [thread:$0]  %s79_s24, 512, %s81_s28, [#allocation9], %s757_s29, %s757_s29, %s758_s30  }
  0x13   :  { %99 = dma.hbm_to_vmem [thread:$0]  %s92_s26, 512, %s94_s4, [#allocation12], %s757_s29, %s757_s29, %s758_s30  }
  0x14   :  { %746 = dma.done.wait [#allocation3], 256  }
  0x15   :  { %747 = vsyncadd [#allocation3], 4294967040 }
  0x16   :  { %748 = dma.done.wait [#allocation6], 1024  }
  0x17   :  { %749 = vsyncadd [#allocation6], 4294966272 }
  0x18   :  { %750 = dma.done.wait [#allocation9], 1024  }
  0x19   :  { %751 = vsyncadd [#allocation9], 4294966272 }
  0x1a   :  { %752 = dma.done.wait [#allocation12], 512  }
  0x1b   :  { %753 = vsyncadd [#allocation12], 4294966784  ;;  %v210_v0 = vld [vmem:[#allocation8 + $0x18] sm:$0xff]  ;;  %v209_v2 = vld [vmem:[#allocation8 + $0x10] sm:$0xff]  ;;  %vm146_vm0 = vcmask 261120   ;;  %vm404_vm1 = vcmask 64512  }
  0x1c   :  { %v241_v1 = vld [vmem:[#allocation10 + $0x18] sm:$0xff]  ;;  %227 = vmatpush.msra.mxu2 %v210_v0  ;;  %v240_v3 = vld [vmem:[#allocation10 + $0x10] sm:$0xff]  ;;  %v208_v4 = vld [vmem:[#allocation8 + $0x8] sm:$0xff]  ;;  %s511_s21 = sshll.u32 %s937_s12, 4  ;;  %s512_s21 = int_to_ptr.hbm [resolvable:$true] %s511_s21 }
  0x1d   :  { %258 = vmatpush.msra.mxu3 %v241_v1  ;;  %v239_v5 = vld [vmem:[#allocation10 + $0x8] sm:$0xff]  ;;  %v141_v6 = vld [vmem:[#allocation5 + $0x18] sm:$0xff]  ;;  %v140_v8 = vld [vmem:[#allocation5 + $0x10] sm:$0xff] }
  0x1e   :  { %228 = vmatpush.msra.mxu2 %v209_v2  ;;  %v179_v7 = vld [vmem:[#allocation7 + $0x18] sm:$0xff]  ;;  %v207_v9 = vld [vmem:[#allocation8] sm:$0xff]  ;;  %165 = vmatpush.msra.mxu0 %v141_v6  ;;  %v178_v11 = vld [vmem:[#allocation7 + $0x10] sm:$0xff] }
  0x1f   :  { %259 = vmatpush.msra.mxu3 %v240_v3  ;;  %v238_v10 = vld [vmem:[#allocation10] sm:$0xff]  ;;  %196 = vmatpush.msra.mxu1 %v179_v7  ;;  %v866_v12 = vld [vmem:[#allocation2] sm:$0xff]  ;;  %v139_v13 = vld [vmem:[#allocation5 + $0x8] sm:$0xff] }
  0x20   :  { %229 = vmatpush.msra.mxu2 %v208_v4  ;;  %166 = vmatpush.msra.mxu0 %v140_v8  ;;  %v177_v14 = vld [vmem:[#allocation7 + $0x8] sm:$0xff]  ;;  %v138_v15 = vld [vmem:[#allocation5] sm:$0xff]  ;;  %v137_v17 = vld [vmem:[#allocation2 + $0x8] sm:$0xff] }
  0x21   :  { %260 = vmatpush.msra.mxu3 %v239_v5  ;;  %197 = vmatpush.msra.mxu1 %v178_v11  ;;  %v176_v16 = vld [vmem:[#allocation7] sm:$0xff]  ;;  %v556_v18 = vld [vmem:[%s933_s8] ss:$0 sm:$0xff]  ;;  %v272_v46 = vld [vmem:[#allocation11 + $0x18] sm:$0xff] }
  0x22   :  { %230 = vmatpush.msra.mxu2 %v207_v9  ;;  %167 = vmatpush.msra.mxu0 %v139_v13  ;;  %v557_v19 = vld [vmem:[%s934_s9] ss:$0 sm:$0xff]  ;;  %v270_v48 = vld [vmem:[#allocation11 + $0x8] sm:$0xff]  ;;  %v269_v49 = vld [vmem:[#allocation11] sm:$0xff] }
  0x23   :  { %261 = vmatpush.msra.mxu3 %v238_v10  ;;  %531 = vmatmul.msk.f32.vlgmr.msra.gmra.mxu2 %vm146_vm0, %v866_v12  ;;  %v558_v20 = vld [vmem:[%s931_s6] ss:$0 sm:$0xff] }
  0x24   :  { %533 = vmatmul.msk.f32.vlgmr.msra.gmra.mxu3 %vm146_vm0, %v866_v12  ;;  %198 = vmatpush.msra.mxu1 %v177_v14  ;;  %v559_v22 = vld [vmem:[%s932_s7] ss:$0 sm:$0xff] }
  0x25   :  { %168 = vmatpush.msra.mxu0 %v138_v15  ;;  %v271_v47 = vld [vmem:[#allocation11 + $0x10] sm:$0xff] }
  0x26   :  { %199 = vmatpush.msra.mxu1 %v176_v16  ;;  %527 = vmatmul.msk.f32.vlgmr.msra.gmra.mxu0 %vm146_vm0, %v866_v12  ;;  %v561_v6 = vld [vmem:[%s935_s10] ss:$0 sm:$0xff]  ;;  %s764_s10 = smov [#allocation13]  }
  0x27   :  { %529 = vmatmul.msk.f32.vlgmr.msra.gmra.mxu1 %vm146_vm0, %v866_v12  ;;  %289 = vmatpush.msrb.mxu0 %v272_v46  ;;  %v560_v14 = vld [vmem:[%s936_s11] ss:$0 sm:$0xff]  ;;  %s509_s11 = sshll.u32 %s764_s10, 4  ;;  %s510_s11 = int_to_ptr.vmem [resolvable:$true] %s509_s11 }
  0x29   :  { %290 = vmatpush.msrb.mxu0 %v271_v47 }
  0x2b   :  { %532 = vmatmul.msk.f32.gmra.mxu2 %vm146_vm0, %v137_v17  ;;  %291 = vmatpush.msrb.mxu0 %v270_v48 }
  0x2c   :  { %534 = vmatmul.msk.f32.gmra.mxu3 %vm146_vm0, %v137_v17 }
  0x2d   :  { %292 = vmatpush.msrb.mxu0 %v269_v49 }
  0x2e   :  { %528 = vmatmul.msk.f32.gmra.mxu0 %vm146_vm0, %v137_v17 }
  0x2f   :  { %530 = vmatmul.msk.f32.gmra.mxu1 %vm146_vm0, %v137_v17 }
  0x36   :  { %535 = vmatmul.msk.f32.vlgmr.msrb.gmra.mxu0 %vm146_vm0, %v866_v12 }
  0x3e   :  { %536 = vmatmul.msk.f32.gmra.mxu0 %vm146_vm0, %v137_v17 }
  0xa3   :  { %v170_v21 = vpop.f32.mrf.mxu0 }
  0xa4   :  { %v201_v23 = vpop.f32.mrf.mxu1  ;;  %v171_v28 = vadd.f32 %v558_v20, %v170_v21 }
  0xa5   :  { %v202_v29 = vadd.f32 %v559_v22, %v201_v23 }
  0xa6   :  { %v232_v24 = vpop.f32.mrf.mxu2 }
  0xa7   :  { %v263_v25 = vpop.f32.mrf.mxu3  ;;  %v233_v26 = vadd.f32 %v556_v18, %v232_v24 }
  0xa8   :  { %v264_v27 = vadd.f32 %v557_v19, %v263_v25 }
  0xa9   :  { %537 = vmatpush.xpose.msk.msrb.mxu1 %vm146_vm0, %v233_v26 }
  0xaa   :  { %541 = vmatpush.xpose.msk.msrb.mxu3 %vm146_vm0, %v264_v27 }
  0xab   :  { %v173_v30 = vpop.f32.mrf.mxu0 }
  0xac   :  { %538 = vmatmul.msk.f32.vlgmr.msrb.gmra.mxu1 %vm146_vm0, %v171_v28  ;;  %v204_v31 = vpop.f32.mrf.mxu1  ;;  %v174_v36 = vadd.f32 %v558_v20, %v173_v30 }
  0xad   :  { %542 = vmatmul.msk.f32.vlgmr.msrb.gmra.mxu3 %vm146_vm0, %v202_v29  ;;  %v205_v37 = vadd.f32 %v559_v22, %v204_v31 }
  0xae   :  { %v235_v32 = vpop.f32.mrf.mxu2 }
  0xaf   :  { %v266_v33 = vpop.f32.mrf.mxu3  ;;  %v236_v34 = vadd.f32 %v556_v18, %v235_v32 }
  0xb0   :  { %v267_v35 = vadd.f32 %v557_v19, %v266_v33 }
  0xb1   :  { %539 = vmatpush.xpose.msk.msrb.mxu2 %vm146_vm0, %v236_v34 }
  0xb2   :  { %543 = vmatpush.xpose.msk.msra.mxu1 %vm146_vm0, %v267_v35 }
  0xb3   :  { %v294_v7 = vpop.f32.mrf.mxu0 }
  0xb4   :  { %540 = vmatmul.msk.f32.vlgmr.msrb.gmra.mxu2 %vm146_vm0, %v174_v36  ;;  %v295_v8 = vadd.f32 %v561_v6, %v294_v7 }
  0xb5   :  { %544 = vmatmul.msk.f32.vlgmr.msra.gmra.mxu1 %vm146_vm0, %v205_v37 }
  0xb6   :  { %475 = vmatpush.msra.mxu2 %v295_v8 }
  0xbb   :  { %v297_v9 = vpop.f32.mrf.mxu0 }
  0xbc   :  { %v298_v10 = vadd.f32 %v561_v6, %v297_v9 }
  0xbe   :  { %498 = vmatpush.msra.mxu3 %v298_v10 }
 0x129   :  { %v323_v38 = vpop.f32.mrf.mxu1 }
 0x12a   :  { %v405_v39 = vsel %vm404_vm1, %v323_v38, -inf }
 0x12b   :  { %406 = vmax.xlane.f32.xlu1 %v405_v39 }
 0x130   :  { %v375_v40 = vpop.f32.mrf.mxu3 }
 0x131   :  { %v427_v41 = vsel %vm404_vm1, %v375_v40, -inf }
 0x132   :  { %428 = vmax.xlane.f32.xlu0 %v427_v41  ;;  %v401_v42 = vpop.f32.mrf.mxu1 }
 0x133   :  { %v430_v43 = vsel %vm404_vm1, %v401_v42, -inf }
 0x137   :  { %v349_v44 = vpop.f32.mrf.mxu2 }
 0x138   :  { %v408_v45 = vsel %vm404_vm1, %v349_v44, -inf }
 0x139   :  { %409 = vmax.xlane.f32.xlu1 %v408_v45 }
 0x13a   :  { %431 = vmax.xlane.f32.xlu0 %v430_v43 }
 0x19e   :  { %v407_v50 = vpop.xlane.xlu1 %406 }
 0x19f   :  { %v411_v51 = vsub.f32 %v323_v38, %v407_v50 }
 0x1a1   :  { %v413_v52 = vmul.f32 1.442695, %v411_v51 }
 0x1a3   :  { %562 = vpow2.f32 %v413_v52 }
 0x1a5   :  { %v429_v53 = vpop.xlane.xlu0 %428 }
 0x1a6   :  { %v433_v54 = vsub.f32 %v375_v40, %v429_v53 }
 0x1a8   :  { %v435_v55 = vmul.f32 1.442695, %v433_v54 }
 0x1a9   :  { %v563_v56 = vpop.eup %562 }
 0x1aa   :  { %564 = vpow2.f32 %v435_v55  ;;  %v417_v57 = vsel %vm404_vm1, %v563_v56, 0.0 }
 0x1ab   :  { %418 = vadd.xlane.f32.xlu0 %v417_v57 }
 0x1ac   :  { %v410_v58 = vpop.xlane.xlu1 %409 }
 0x1ad   :  { %v432_v59 = vpop.xlane.xlu0 %431  ;;  %v412_v60 = vsub.f32 %v349_v44, %v410_v58 }
 0x1ae   :  { %v434_v61 = vsub.f32 %v401_v42, %v432_v59 }
 0x1af   :  { %v415_v63 = vmul.f32 1.442695, %v412_v60 }
 0x1b0   :  { %v565_v62 = vpop.eup %564  ;;  %v437_v0 = vmul.f32 1.442695, %v434_v61 }
 0x1b1   :  { %v439_v1 = vsel %vm404_vm1, %v565_v62, 0.0  ;;  %566 = vpow2.f32 %v415_v63 }
 0x1b2   :  { %440 = vadd.xlane.f32.xlu2 %v439_v1  ;;  %568 = vpow2.f32 %v437_v0 }
 0x1b7   :  { %v567_v2 = vpop.eup %566 }
 0x1b8   :  { %v569_v3 = vpop.eup %568  ;;  %v420_v4 = vsel %vm404_vm1, %v567_v2, 0.0 }
 0x1b9   :  { %421 = vadd.xlane.f32.xlu1 %v420_v4  ;;  %v442_v5 = vsel %vm404_vm1, %v569_v3, 0.0 }
 0x1ba   :  { %443 = vadd.xlane.f32.xlu2 %v442_v5 }
 0x21e   :  { %v419_v11 = vpop.xlane.xlu0 %418 }
 0x21f   :  { %570 = vrcp.f32 %v419_v11 }
 0x225   :  { %v441_v12 = vpop.xlane.xlu2 %440  ;;  %v571_v13 = vpop.eup %570 }
 0x226   :  { %572 = vrcp.f32 %v441_v12  ;;  %v425_v19 = vmul.f32 %v571_v13, %v563_v56 }
 0x22c   :  { %v573_v15 = vpop.eup %572  ;;  %v422_v17 = vpop.xlane.xlu1 %421 }
 0x22d   :  { %v447_v16 = vmul.f32 %v573_v15, %v565_v62  ;;  %574 = vrcp.f32 %v422_v17  ;;  %v444_v18 = vpop.xlane.xlu2 %443 }
 0x22e   :  { %576 = vrcp.f32 %v444_v18 }
 0x22f   :  { %v453_v20 = vmul.f32 %v560_v14, %v447_v16 }
 0x231   :  { %v455_v21 = vsub.f32 %v425_v19, %v453_v20 }
 0x233   :  { %545 = vmatmul.msk.f32.vlgmr.msra.gmra.mxu2 %vm404_vm1, %v455_v21  ;;  %v575_v22 = vpop.eup %574 }
 0x234   :  { %v577_v23 = vpop.eup %576  ;;  %v426_v25 = vmul.f32 %v575_v22, %v567_v2 }
 0x235   :  { %v448_v24 = vmul.f32 %v577_v23, %v569_v3 }
 0x237   :  { %v454_v26 = vmul.f32 %v560_v14, %v448_v24 }
 0x239   :  { %v456_v27 = vsub.f32 %v426_v25, %v454_v26 }
 0x23b   :  { %546 = vmatmul.msk.f32.vlgmr.msra.gmra.mxu3 %vm404_vm1, %v456_v27 }
 0x2b6   :  { %v477_v28 = vpop.f32.mrf.mxu2 }
 0x2b7   :  { %503 = vst [vmem:[#allocation13] sm:$0xff] %v477_v28 }
 0x2be   :  { %v500_v29 = vpop.f32.mrf.mxu3 }
 0x2bf   :  { %504 = vst [vmem:[#allocation13 + $0x8] sm:$0xff] %v500_v29 }
 0x2c0   :  { %517 = dma.vmem_to_hbm [thread:$0]  %s510_s11, 256, %s512_s21, [#allocation4], %s757_s29, %s757_s29, %s758_s30  }
 0x2c1   :  { %754 = dma.done.wait [#allocation4], 256  }
 0x2c2   :  { %755 = vsyncadd [#allocation4], 4294967040 }
 0x2c3   :  { %522 = vsyncpa [#allocation3], 1 }
 0x2c4   :  { %523 = vsyncpa [#allocation6], 1 }
 0x2c5   :  { %524 = vsyncpa [#allocation9], 1 }
 0x2c6   :  { %525 = vsyncpa [#allocation12], 1 }
 0x2c7   :  { %526 = vsyncpa [#allocation4], 1 }

</bundles_post_ra>
